<compile_context>
chip_gen: v7x
topology: tpu7x:2x2x1
jax: 0.10.0
libtpu: 0.0.40
codegen_flags: <defaults>
</compile_context>

<pallas_src>
import jax
import jax.numpy as jnp
from jax.experimental import pallas as pl
from jax.experimental.pallas import tpu as pltpu


# ----------------------------- Pallas kernel ------------------------------- #

def _make_cin_kernel(feat_size, hidden, emb, b_tile, compute_dtype):
    """Build the CIN kernel for a fixed layer config / batch tile / dtype."""
    num_layers = len(hidden)
    layer_rows = [feat_size] + list(hidden)

    def kernel(*refs):
        x0_ref = refs[0]                      # (D, m, Bt) compute_dtype
        w_refs = refs[1:1 + num_layers]       # (H_l, m*H_{l-1}) compute_dtype
        lin_w_ref = refs[1 + num_layers]      # (1, sum_H) f32
        bias_ref = refs[2 + num_layers]       # (1,) f32 in SMEM
        out_ref = refs[3 + num_layers]        # (1, Bt) f32

        # Per-embedding-dim slabs of x0 (leading-axis indexing, no relayout).
        x0_slabs = [x0_ref[d] for d in range(emb)]           # emb x (m, Bt)

        prev_slabs = x0_slabs
        pooled = []
        for l in range(num_layers):
            hp = layer_rows[l]
            w = w_refs[l][...]                                # (H, m*hp)
            p_l = None
            new_slabs = []
            for d in range(emb):
                # Pairwise interactions for this embedding dim (VPU):
                #   z_d[(j, i), :] = x0[d, j, :] * x_prev[d, i, :]
                z_d = (x0_slabs[d][:, None, :] *
                       prev_slabs[d][None, :, :]).reshape(feat_size * hp, b_tile)
                # CIN contraction on the MXU, f32 accumulation.
                xk_d = jnp.dot(w, z_d,
                               preferred_element_type=jnp.float32)   # (H, Bt)
                # Sum-pool over the embedding dim == accumulate across d (VPU).
                p_l = xk_d if p_l is None else p_l + xk_d
                if l + 1 < num_layers:
                    new_slabs.append(xk_d.astype(compute_dtype))      # reg carry
            pooled.append(jnp.maximum(p_l, 0.0))                      # ReLU
            prev_slabs = new_slabs

        # Final Linear(sum_H, 1): one small MXU matmul over concatenated rows.
        r = jnp.concatenate(pooled, axis=0)                           # (sum_H, Bt)
        logits = jnp.dot(lin_w_ref[...], r,
                         preferred_element_type=jnp.float32)          # (1, Bt)
        out_ref[...] = jax.nn.sigmoid(logits + bias_ref[0])

    return kernel


def _pick_b_tile(batch):
    """Largest lane-dense batch tile (multiple of 128, <= 1024) that keeps
    >= 2 grid steps when possible (so v7x megacore can shard the batch)."""
    if batch % 128 != 0:
        return batch  # tiny/odd batch: single full-extent block (correctness path)
    b_tile = 128
    while (batch % (2 * b_tile) == 0 and 2 * b_tile <= 1024
           and batch // (2 * b_tile) >= 2):
        b_tile *= 2
    return b_tile


def cin_pallas_forward(x0_dmb, cin_ws, lin_w, lin_b, *, b_tile=None):
    """CIN + sum-pool + ReLU + Linear + sigmoid.

    x0_dmb : (D, m, B) embedded features, d-major kernel layout.
    cin_ws : list of (H_l, m*H_{l-1}) flattened CIN weights (col idx j*H_{l-1}+i).
    lin_w  : (1, sum_H);  lin_b : (1,).
    Returns sigmoid scores of shape (B, 1)."""
    emb, feat, B = x0_dmb.shape
    hidden = [int(w.shape[0]) for w in cin_ws]
    layer_rows = [feat] + hidden
    for l, w in enumerate(cin_ws):
        assert w.shape == (hidden[l], feat * layer_rows[l]), (l, w.shape)

    compute_dtype = x0_dmb.dtype
    cin_ws = [w.astype(compute_dtype) for w in cin_ws]
    lin_w = lin_w.astype(jnp.float32)
    lin_b = lin_b.astype(jnp.float32)

    if b_tile is None:
        b_tile = _pick_b_tile(B)
    assert B % b_tile == 0, (B, b_tile)
    assert (b_tile % 128 == 0) or (b_tile == B), (B, b_tile)
    num_tiles = B // b_tile

    in_specs = [pl.BlockSpec((emb, feat, b_tile), lambda i: (0, 0, i))]
    # Grid-invariant weights; with H<=8 their double-buffered VMEM footprint is
    # negligible, so pipeline_mode=pl.Buffered(1) is intentionally skipped.
    in_specs += [pl.BlockSpec(w.shape, lambda i: (0, 0)) for w in cin_ws]
    in_specs += [
        pl.BlockSpec(lin_w.shape, lambda i: (0, 0)),
        pl.BlockSpec(memory_space=pltpu.MemorySpace.SMEM),   # scalar bias
    ]
    out_spec = pl.BlockSpec((1, b_tile), lambda i: (0, i))

    kernel = _make_cin_kernel(feat, hidden, emb, b_tile, compute_dtype)

    # Advisory cost estimate for XLA scheduling around the custom call.
    mm_flops = 2 * B * emb * sum(feat * layer_rows[l] * hidden[l]
                                 for l in range(len(hidden)))
    epi_flops = B * emb * sum(hidden) + 2 * B * sum(hidden)
    itemsize = jnp.dtype(compute_dtype).itemsize
    bytes_accessed = (itemsize * (emb * feat * B + sum(int(w.size) for w in cin_ws))
                      + 4 * (int(lin_w.size) + 1 + B))
    cost = pl.CostEstimate(flops=int(mm_flops + epi_flops),
                           transcendentals=int(B),
                           bytes_accessed=int(bytes_accessed))

    out = pl.pallas_call(
        kernel,
        out_shape=jax.ShapeDtypeStruct((1, B), jnp.float32),
        grid=(num_tiles,),
        in_specs=in_specs,
        out_specs=out_spec,
        compiler_params=pltpu.CompilerParams(
            dimension_semantics=("parallel",)),
        cost_estimate=cost,
    )(x0_dmb, *cin_ws, lin_w, lin_b)

    return out.reshape(B, 1)


# ------------------------------ JAX glue ----------------------------------- #

def embed_features_kernel_layout(features_x, decr_params, dtype=jnp.float32):
    """Per-feature Linear(dim_i, emb) computed directly in (emb, batch)
    orientation and stacked to the kernel's (D, m, B) layout -- no post-hoc
    HBM transpose pass."""
    cols = [w @ x.astype(jnp.float32).T + b[:, None]      # (D, B)
            for x, (w, b) in zip(features_x, decr_params)]
    return jnp.stack(cols, axis=1).astype(dtype)           # (D, m, B)


def init_params(features, emb_size, cin_hidden_layers):
    """Deterministic synthetic parameters mirroring CinModel.__init__ shapes.
    CIN weights are pre-flattened to (H_l, feat_size * H_{l-1}) with column
    index j * H_{l-1} + i, ready for the in-kernel MXU contraction."""
    feat_size = len(features)
    key = jax.random.PRNGKey(0)

    decr_params = []
    for _, dim in features:
        key, kw, kb = jax.random.split(key, 3)
        w = 0.1 * jax.random.normal(kw, (emb_size, dim), jnp.float32)
        b = 0.1 * jax.random.normal(kb, (emb_size,), jnp.float32)
        decr_params.append((w, b))

    cin_ws = []
    h_prev = feat_size
    for h in cin_hidden_layers:
        key, kw = jax.random.split(key)
        cin_ws.append(0.1 * jax.random.normal(kw, (h, feat_size * h_prev), jnp.float32))
        h_prev = h

    key, kw, kb = jax.random.split(key, 3)
    sum_h = sum(cin_hidden_layers)
    lin_w = 0.1 * jax.random.normal(kw, (1, sum_h), jnp.float32)
    lin_b = 0.1 * jax.random.normal(kb, (1,), jnp.float32)
    return decr_params, cin_ws, lin_w, lin_b


def reference_forward(x0, cin_ws, lin_w, lin_b):
    """Pure-JAX f32 reference of the CIN + pooling + ReLU + Linear + sigmoid path."""
    B, m, D = x0.shape
    x_prev, pooled = x0, []
    for wf in cin_ws:
        h = wf.shape[0]
        w = wf.reshape(h, m, x_prev.shape[1])               # (H, m, Hp)
        xk = jnp.einsum('hji,bjd,bid->bhd', w, x0, x_prev,
                        precision=jax.lax.Precision.HIGHEST)
        pooled.append(jnp.sum(xk, axis=-1))
        x_prev = xk
    p = jnp.concatenate(pooled, axis=-1)
    r = jnp.maximum(p, 0.0)
    logits = jnp.dot(r, lin_w.T, precision=jax.lax.Precision.HIGHEST) + lin_b
    return jax.nn.sigmoid(logits)


def pick_compute_dtype():
    """bf16 operands on bf16-native VPU parts (v6e/v7x); f32 elsewhere (v5e etc.)."""
    try:
        kind = jax.devices()[0].device_kind.lower()
    except Exception:
        return jnp.float32
    if any(old in kind for old in ("v2", "v3", "v4", "v5")):
        return jnp.float32
    return jnp.bfloat16


# --------------------------------- main ------------------------------------ #

if __name__ == "__main__":
    # Small deterministic configuration consistent with the module:
    features = [("a", 5), ("b", 7), ("c", 3), ("d", 9)]   # (name, dim) pairs
    emb_size = 16                                         # config['feature_dim']
    cin_hidden_layers = [8, 8]                            # config['cin_hidden_layers']
    batch = 256   # default b_tile=128 -> lane-dense tiles, 2 grid steps (megacore)

    decr_params, cin_ws, lin_w, lin_b = init_params(
        features, emb_size, cin_hidden_layers)

    key = jax.random.PRNGKey(0)
    features_x = []
    for _, dim in features:
        key, kx = jax.random.split(key)
        features_x.append(jax.random.normal(kx, (batch, dim), jnp.float32))

    compute_dtype = pick_compute_dtype()
    # glue: per-feature Linear -> (D, m, B) kernel layout (no extra HBM transpose)
    x0_dmb = embed_features_kernel_layout(features_x, decr_params, dtype=compute_dtype)
    cin_ws_c = [w.astype(compute_dtype) for w in cin_ws]

    fwd = jax.jit(cin_pallas_forward)
    out = jax.block_until_ready(fwd(x0_dmb, cin_ws_c, lin_w, lin_b))

    # Pure-JAX f32 reference from the *same* (possibly bf16-rounded) embeddings.
    x0_bmd = jnp.transpose(x0_dmb.astype(jnp.float32), (2, 1, 0))   # (B, m, D)
    ref = reference_forward(x0_bmd, cin_ws, lin_w, lin_b)

    tol = 2e-2 if compute_dtype == jnp.bfloat16 else 2e-3
    assert out.shape == (batch, 1), out.shape
    assert jnp.allclose(out, ref, atol=tol, rtol=tol), (out, ref)

    print("KERNEL_OK")
</pallas_src>

<mosaic_0001>
module attributes {stable_mosaic.version = 11 : i64} {
  func.func @kernel(%arg0: i32, %arg1: memref<16x4x128xbf16, #tpu.memory_space<vmem>>, %arg2: memref<8x16xbf16, #tpu.memory_space<vmem>>, %arg3: memref<8x32xbf16, #tpu.memory_space<vmem>>, %arg4: memref<1x16xf32, #tpu.memory_space<vmem>>, %arg5: memref<1xf32, #tpu.memory_space<smem>>, %arg6: memref<1x128xf32, #tpu.memory_space<vmem>>) attributes {dimension_semantics = [#tpu.dimension_semantics<parallel>], iteration_bounds = array<i64: 2>, scalar_prefetch = 0 : i64, scratch_operands = 0 : i64, tpu.core_type = #tpu.core_type<tc>, window_params = [{transform_indices = @transform_0, window_bounds = array<i64: 16, 4, 128>}, {pipeline_mode = #tpu.pipeline_mode<synchronous>, transform_indices = @transform_1, window_bounds = array<i64: 8, 16>}, {pipeline_mode = #tpu.pipeline_mode<synchronous>, transform_indices = @transform_2, window_bounds = array<i64: 8, 32>}, {pipeline_mode = #tpu.pipeline_mode<synchronous>, transform_indices = @transform_3, window_bounds = array<i64: 1, 16>}, {transform_indices = @transform_4, window_bounds = array<i64: 1>}, {transform_indices = @transform_5, window_bounds = array<i64: 1, 128>}]} {
    %c0 = arith.constant 0 : index
    %c0_0 = arith.constant 0 : index
    %c0_1 = arith.constant 0 : index
    %0 = vector.load %arg1[%c0, %c0_0, %c0_1] : memref<16x4x128xbf16, #tpu.memory_space<vmem>>, vector<1x4x128xbf16>
    %1 = vector.shape_cast %0 : vector<1x4x128xbf16> to vector<4x128xbf16>
    %c1 = arith.constant 1 : index
    %c0_2 = arith.constant 0 : index
    %c0_3 = arith.constant 0 : index
    %2 = vector.load %arg1[%c1, %c0_2, %c0_3] : memref<16x4x128xbf16, #tpu.memory_space<vmem>>, vector<1x4x128xbf16>
    %3 = vector.shape_cast %2 : vector<1x4x128xbf16> to vector<4x128xbf16>
    %c2 = arith.constant 2 : index
    %c0_4 = arith.constant 0 : index
    %c0_5 = arith.constant 0 : index
    %4 = vector.load %arg1[%c2, %c0_4, %c0_5] : memref<16x4x128xbf16, #tpu.memory_space<vmem>>, vector<1x4x128xbf16>
    %5 = vector.shape_cast %4 : vector<1x4x128xbf16> to vector<4x128xbf16>
    %c3 = arith.constant 3 : index
    %c0_6 = arith.constant 0 : index
    %c0_7 = arith.constant 0 : index
    %6 = vector.load %arg1[%c3, %c0_6, %c0_7] : memref<16x4x128xbf16, #tpu.memory_space<vmem>>, vector<1x4x128xbf16>
    %7 = vector.shape_cast %6 : vector<1x4x128xbf16> to vector<4x128xbf16>
    %c4 = arith.constant 4 : index
    %c0_8 = arith.constant 0 : index
    %c0_9 = arith.constant 0 : index
    %8 = vector.load %arg1[%c4, %c0_8, %c0_9] : memref<16x4x128xbf16, #tpu.memory_space<vmem>>, vector<1x4x128xbf16>
    %9 = vector.shape_cast %8 : vector<1x4x128xbf16> to vector<4x128xbf16>
    %c5 = arith.constant 5 : index
    %c0_10 = arith.constant 0 : index
    %c0_11 = arith.constant 0 : index
    %10 = vector.load %arg1[%c5, %c0_10, %c0_11] : memref<16x4x128xbf16, #tpu.memory_space<vmem>>, vector<1x4x128xbf16>
    %11 = vector.shape_cast %10 : vector<1x4x128xbf16> to vector<4x128xbf16>
    %c6 = arith.constant 6 : index
    %c0_12 = arith.constant 0 : index
    %c0_13 = arith.constant 0 : index
    %12 = vector.load %arg1[%c6, %c0_12, %c0_13] : memref<16x4x128xbf16, #tpu.memory_space<vmem>>, vector<1x4x128xbf16>
    %13 = vector.shape_cast %12 : vector<1x4x128xbf16> to vector<4x128xbf16>
    %c7 = arith.constant 7 : index
    %c0_14 = arith.constant 0 : index
    %c0_15 = arith.constant 0 : index
    %14 = vector.load %arg1[%c7, %c0_14, %c0_15] : memref<16x4x128xbf16, #tpu.memory_space<vmem>>, vector<1x4x128xbf16>
    %15 = vector.shape_cast %14 : vector<1x4x128xbf16> to vector<4x128xbf16>
    %c8 = arith.constant 8 : index
    %c0_16 = arith.constant 0 : index
    %c0_17 = arith.constant 0 : index
    %16 = vector.load %arg1[%c8, %c0_16, %c0_17] : memref<16x4x128xbf16, #tpu.memory_space<vmem>>, vector<1x4x128xbf16>
    %17 = vector.shape_cast %16 : vector<1x4x128xbf16> to vector<4x128xbf16>
    %c9 = arith.constant 9 : index
    %c0_18 = arith.constant 0 : index
    %c0_19 = arith.constant 0 : index
    %18 = vector.load %arg1[%c9, %c0_18, %c0_19] : memref<16x4x128xbf16, #tpu.memory_space<vmem>>, vector<1x4x128xbf16>
    %19 = vector.shape_cast %18 : vector<1x4x128xbf16> to vector<4x128xbf16>
    %c10 = arith.constant 10 : index
    %c0_20 = arith.constant 0 : index
    %c0_21 = arith.constant 0 : index
    %20 = vector.load %arg1[%c10, %c0_20, %c0_21] : memref<16x4x128xbf16, #tpu.memory_space<vmem>>, vector<1x4x128xbf16>
    %21 = vector.shape_cast %20 : vector<1x4x128xbf16> to vector<4x128xbf16>
    %c11 = arith.constant 11 : index
    %c0_22 = arith.constant 0 : index
    %c0_23 = arith.constant 0 : index
    %22 = vector.load %arg1[%c11, %c0_22, %c0_23] : memref<16x4x128xbf16, #tpu.memory_space<vmem>>, vector<1x4x128xbf16>
    %23 = vector.shape_cast %22 : vector<1x4x128xbf16> to vector<4x128xbf16>
    %c12 = arith.constant 12 : index
    %c0_24 = arith.constant 0 : index
    %c0_25 = arith.constant 0 : index
    %24 = vector.load %arg1[%c12, %c0_24, %c0_25] : memref<16x4x128xbf16, #tpu.memory_space<vmem>>, vector<1x4x128xbf16>
    %25 = vector.shape_cast %24 : vector<1x4x128xbf16> to vector<4x128xbf16>
    %c13 = arith.constant 13 : index
    %c0_26 = arith.constant 0 : index
    %c0_27 = arith.constant 0 : index
    %26 = vector.load %arg1[%c13, %c0_26, %c0_27] : memref<16x4x128xbf16, #tpu.memory_space<vmem>>, vector<1x4x128xbf16>
    %27 = vector.shape_cast %26 : vector<1x4x128xbf16> to vector<4x128xbf16>
    %c14 = arith.constant 14 : index
    %c0_28 = arith.constant 0 : index
    %c0_29 = arith.constant 0 : index
    %28 = vector.load %arg1[%c14, %c0_28, %c0_29] : memref<16x4x128xbf16, #tpu.memory_space<vmem>>, vector<1x4x128xbf16>
    %29 = vector.shape_cast %28 : vector<1x4x128xbf16> to vector<4x128xbf16>
    %c15 = arith.constant 15 : index
    %c0_30 = arith.constant 0 : index
    %c0_31 = arith.constant 0 : index
    %30 = vector.load %arg1[%c15, %c0_30, %c0_31] : memref<16x4x128xbf16, #tpu.memory_space<vmem>>, vector<1x4x128xbf16>
    %31 = vector.shape_cast %30 : vector<1x4x128xbf16> to vector<4x128xbf16>
    %c0_32 = arith.constant 0 : index
    %c0_33 = arith.constant 0 : index
    %32 = vector.load %arg2[%c0_32, %c0_33] : memref<8x16xbf16, #tpu.memory_space<vmem>>, vector<8x16xbf16>
    %33 = vector.shape_cast %1 : vector<4x128xbf16> to vector<4x1x128xbf16>
    %34 = vector.shape_cast %1 : vector<4x128xbf16> to vector<1x4x128xbf16>
    %35 = vector.broadcast %33 : vector<4x1x128xbf16> to vector<4x4x128xbf16>
    %36 = vector.broadcast %34 : vector<1x4x128xbf16> to vector<4x4x128xbf16>
    %37 = arith.mulf %35, %36 : vector<4x4x128xbf16>
    %38 = vector.shape_cast %37 : vector<4x4x128xbf16> to vector<16x128xbf16>
    %cst = arith.constant dense<0.000000e+00> : vector<8x128xf32>
    %39 = tpu.matmul %32, %38, %cst {dimension_numbers = #tpu.dot_dimension_numbers<[1], [0], [0], [1], [0, 0, 1, 1], [], []>} : vector<8x16xbf16>, vector<16x128xbf16>, vector<8x128xf32> -> vector<8x128xf32>
    %40 = arith.truncf %39 : vector<8x128xf32> to vector<8x128xbf16>
    %41 = vector.shape_cast %3 : vector<4x128xbf16> to vector<4x1x128xbf16>
    %42 = vector.shape_cast %3 : vector<4x128xbf16> to vector<1x4x128xbf16>
    %43 = vector.broadcast %41 : vector<4x1x128xbf16> to vector<4x4x128xbf16>
    %44 = vector.broadcast %42 : vector<1x4x128xbf16> to vector<4x4x128xbf16>
    %45 = arith.mulf %43, %44 : vector<4x4x128xbf16>
    %46 = vector.shape_cast %45 : vector<4x4x128xbf16> to vector<16x128xbf16>
    %cst_34 = arith.constant dense<0.000000e+00> : vector<8x128xf32>
    %47 = tpu.matmul %32, %46, %cst_34 {dimension_numbers = #tpu.dot_dimension_numbers<[1], [0], [0], [1], [0, 0, 1, 1], [], []>} : vector<8x16xbf16>, vector<16x128xbf16>, vector<8x128xf32> -> vector<8x128xf32>
    %48 = arith.addf %39, %47 : vector<8x128xf32>
    %49 = arith.truncf %47 : vector<8x128xf32> to vector<8x128xbf16>
    %50 = vector.shape_cast %5 : vector<4x128xbf16> to vector<4x1x128xbf16>
    %51 = vector.shape_cast %5 : vector<4x128xbf16> to vector<1x4x128xbf16>
    %52 = vector.broadcast %50 : vector<4x1x128xbf16> to vector<4x4x128xbf16>
    %53 = vector.broadcast %51 : vector<1x4x128xbf16> to vector<4x4x128xbf16>
    %54 = arith.mulf %52, %53 : vector<4x4x128xbf16>
    %55 = vector.shape_cast %54 : vector<4x4x128xbf16> to vector<16x128xbf16>
    %cst_35 = arith.constant dense<0.000000e+00> : vector<8x128xf32>
    %56 = tpu.matmul %32, %55, %cst_35 {dimension_numbers = #tpu.dot_dimension_numbers<[1], [0], [0], [1], [0, 0, 1, 1], [], []>} : vector<8x16xbf16>, vector<16x128xbf16>, vector<8x128xf32> -> vector<8x128xf32>
    %57 = arith.addf %48, %56 : vector<8x128xf32>
    %58 = arith.truncf %56 : vector<8x128xf32> to vector<8x128xbf16>
    %59 = vector.shape_cast %7 : vector<4x128xbf16> to vector<4x1x128xbf16>
    %60 = vector.shape_cast %7 : vector<4x128xbf16> to vector<1x4x128xbf16>
    %61 = vector.broadcast %59 : vector<4x1x128xbf16> to vector<4x4x128xbf16>
    %62 = vector.broadcast %60 : vector<1x4x128xbf16> to vector<4x4x128xbf16>
    %63 = arith.mulf %61, %62 : vector<4x4x128xbf16>
    %64 = vector.shape_cast %63 : vector<4x4x128xbf16> to vector<16x128xbf16>
    %cst_36 = arith.constant dense<0.000000e+00> : vector<8x128xf32>
    %65 = tpu.matmul %32, %64, %cst_36 {dimension_numbers = #tpu.dot_dimension_numbers<[1], [0], [0], [1], [0, 0, 1, 1], [], []>} : vector<8x16xbf16>, vector<16x128xbf16>, vector<8x128xf32> -> vector<8x128xf32>
    %66 = arith.addf %57, %65 : vector<8x128xf32>
    %67 = arith.truncf %65 : vector<8x128xf32> to vector<8x128xbf16>
    %68 = vector.shape_cast %9 : vector<4x128xbf16> to vector<4x1x128xbf16>
    %69 = vector.shape_cast %9 : vector<4x128xbf16> to vector<1x4x128xbf16>
    %70 = vector.broadcast %68 : vector<4x1x128xbf16> to vector<4x4x128xbf16>
    %71 = vector.broadcast %69 : vector<1x4x128xbf16> to vector<4x4x128xbf16>
    %72 = arith.mulf %70, %71 : vector<4x4x128xbf16>
    %73 = vector.shape_cast %72 : vector<4x4x128xbf16> to vector<16x128xbf16>
    %cst_37 = arith.constant dense<0.000000e+00> : vector<8x128xf32>
    %74 = tpu.matmul %32, %73, %cst_37 {dimension_numbers = #tpu.dot_dimension_numbers<[1], [0], [0], [1], [0, 0, 1, 1], [], []>} : vector<8x16xbf16>, vector<16x128xbf16>, vector<8x128xf32> -> vector<8x128xf32>
    %75 = arith.addf %66, %74 : vector<8x128xf32>
    %76 = arith.truncf %74 : vector<8x128xf32> to vector<8x128xbf16>
    %77 = vector.shape_cast %11 : vector<4x128xbf16> to vector<4x1x128xbf16>
    %78 = vector.shape_cast %11 : vector<4x128xbf16> to vector<1x4x128xbf16>
    %79 = vector.broadcast %77 : vector<4x1x128xbf16> to vector<4x4x128xbf16>
    %80 = vector.broadcast %78 : vector<1x4x128xbf16> to vector<4x4x128xbf16>
    %81 = arith.mulf %79, %80 : vector<4x4x128xbf16>
    %82 = vector.shape_cast %81 : vector<4x4x128xbf16> to vector<16x128xbf16>
    %cst_38 = arith.constant dense<0.000000e+00> : vector<8x128xf32>
    %83 = tpu.matmul %32, %82, %cst_38 {dimension_numbers = #tpu.dot_dimension_numbers<[1], [0], [0], [1], [0, 0, 1, 1], [], []>} : vector<8x16xbf16>, vector<16x128xbf16>, vector<8x128xf32> -> vector<8x128xf32>
    %84 = arith.addf %75, %83 : vector<8x128xf32>
    %85 = arith.truncf %83 : vector<8x128xf32> to vector<8x128xbf16>
    %86 = vector.shape_cast %13 : vector<4x128xbf16> to vector<4x1x128xbf16>
    %87 = vector.shape_cast %13 : vector<4x128xbf16> to vector<1x4x128xbf16>
    %88 = vector.broadcast %86 : vector<4x1x128xbf16> to vector<4x4x128xbf16>
    %89 = vector.broadcast %87 : vector<1x4x128xbf16> to vector<4x4x128xbf16>
    %90 = arith.mulf %88, %89 : vector<4x4x128xbf16>
    %91 = vector.shape_cast %90 : vector<4x4x128xbf16> to vector<16x128xbf16>
    %cst_39 = arith.constant dense<0.000000e+00> : vector<8x128xf32>
    %92 = tpu.matmul %32, %91, %cst_39 {dimension_numbers = #tpu.dot_dimension_numbers<[1], [0], [0], [1], [0, 0, 1, 1], [], []>} : vector<8x16xbf16>, vector<16x128xbf16>, vector<8x128xf32> -> vector<8x128xf32>
    %93 = arith.addf %84, %92 : vector<8x128xf32>
    %94 = arith.truncf %92 : vector<8x128xf32> to vector<8x128xbf16>
    %95 = vector.shape_cast %15 : vector<4x128xbf16> to vector<4x1x128xbf16>
    %96 = vector.shape_cast %15 : vector<4x128xbf16> to vector<1x4x128xbf16>
    %97 = vector.broadcast %95 : vector<4x1x128xbf16> to vector<4x4x128xbf16>
    %98 = vector.broadcast %96 : vector<1x4x128xbf16> to vector<4x4x128xbf16>
    %99 = arith.mulf %97, %98 : vector<4x4x128xbf16>
    %100 = vector.shape_cast %99 : vector<4x4x128xbf16> to vector<16x128xbf16>
    %cst_40 = arith.constant dense<0.000000e+00> : vector<8x128xf32>
    %101 = tpu.matmul %32, %100, %cst_40 {dimension_numbers = #tpu.dot_dimension_numbers<[1], [0], [0], [1], [0, 0, 1, 1], [], []>} : vector<8x16xbf16>, vector<16x128xbf16>, vector<8x128xf32> -> vector<8x128xf32>
    %102 = arith.addf %93, %101 : vector<8x128xf32>
    %103 = arith.truncf %101 : vector<8x128xf32> to vector<8x128xbf16>
    %104 = vector.shape_cast %17 : vector<4x128xbf16> to vector<4x1x128xbf16>
    %105 = vector.shape_cast %17 : vector<4x128xbf16> to vector<1x4x128xbf16>
    %106 = vector.broadcast %104 : vector<4x1x128xbf16> to vector<4x4x128xbf16>
    %107 = vector.broadcast %105 : vector<1x4x128xbf16> to vector<4x4x128xbf16>
    %108 = arith.mulf %106, %107 : vector<4x4x128xbf16>
    %109 = vector.shape_cast %108 : vector<4x4x128xbf16> to vector<16x128xbf16>
    %cst_41 = arith.constant dense<0.000000e+00> : vector<8x128xf32>
    %110 = tpu.matmul %32, %109, %cst_41 {dimension_numbers = #tpu.dot_dimension_numbers<[1], [0], [0], [1], [0, 0, 1, 1], [], []>} : vector<8x16xbf16>, vector<16x128xbf16>, vector<8x128xf32> -> vector<8x128xf32>
    %111 = arith.addf %102, %110 : vector<8x128xf32>
    %112 = arith.truncf %110 : vector<8x128xf32> to vector<8x128xbf16>
    %113 = vector.shape_cast %19 : vector<4x128xbf16> to vector<4x1x128xbf16>
    %114 = vector.shape_cast %19 : vector<4x128xbf16> to vector<1x4x128xbf16>
    %115 = vector.broadcast %113 : vector<4x1x128xbf16> to vector<4x4x128xbf16>
    %116 = vector.broadcast %114 : vector<1x4x128xbf16> to vector<4x4x128xbf16>
    %117 = arith.mulf %115, %116 : vector<4x4x128xbf16>
    %118 = vector.shape_cast %117 : vector<4x4x128xbf16> to vector<16x128xbf16>
    %cst_42 = arith.constant dense<0.000000e+00> : vector<8x128xf32>
    %119 = tpu.matmul %32, %118, %cst_42 {dimension_numbers = #tpu.dot_dimension_numbers<[1], [0], [0], [1], [0, 0, 1, 1], [], []>} : vector<8x16xbf16>, vector<16x128xbf16>, vector<8x128xf32> -> vector<8x128xf32>
    %120 = arith.addf %111, %119 : vector<8x128xf32>
    %121 = arith.truncf %119 : vector<8x128xf32> to vector<8x128xbf16>
    %122 = vector.shape_cast %21 : vector<4x128xbf16> to vector<4x1x128xbf16>
    %123 = vector.shape_cast %21 : vector<4x128xbf16> to vector<1x4x128xbf16>
    %124 = vector.broadcast %122 : vector<4x1x128xbf16> to vector<4x4x128xbf16>
    %125 = vector.broadcast %123 : vector<1x4x128xbf16> to vector<4x4x128xbf16>
    %126 = arith.mulf %124, %125 : vector<4x4x128xbf16>
    %127 = vector.shape_cast %126 : vector<4x4x128xbf16> to vector<16x128xbf16>
    %cst_43 = arith.constant dense<0.000000e+00> : vector<8x128xf32>
    %128 = tpu.matmul %32, %127, %cst_43 {dimension_numbers = #tpu.dot_dimension_numbers<[1], [0], [0], [1], [0, 0, 1, 1], [], []>} : vector<8x16xbf16>, vector<16x128xbf16>, vector<8x128xf32> -> vector<8x128xf32>
    %129 = arith.addf %120, %128 : vector<8x128xf32>
    %130 = arith.truncf %128 : vector<8x128xf32> to vector<8x128xbf16>
    %131 = vector.shape_cast %23 : vector<4x128xbf16> to vector<4x1x128xbf16>
    %132 = vector.shape_cast %23 : vector<4x128xbf16> to vector<1x4x128xbf16>
    %133 = vector.broadcast %131 : vector<4x1x128xbf16> to vector<4x4x128xbf16>
    %134 = vector.broadcast %132 : vector<1x4x128xbf16> to vector<4x4x128xbf16>
    %135 = arith.mulf %133, %134 : vector<4x4x128xbf16>
    %136 = vector.shape_cast %135 : vector<4x4x128xbf16> to vector<16x128xbf16>
    %cst_44 = arith.constant dense<0.000000e+00> : vector<8x128xf32>
    %137 = tpu.matmul %32, %136, %cst_44 {dimension_numbers = #tpu.dot_dimension_numbers<[1], [0], [0], [1], [0, 0, 1, 1], [], []>} : vector<8x16xbf16>, vector<16x128xbf16>, vector<8x128xf32> -> vector<8x128xf32>
    %138 = arith.addf %129, %137 : vector<8x128xf32>
    %139 = arith.truncf %137 : vector<8x128xf32> to vector<8x128xbf16>
    %140 = vector.shape_cast %25 : vector<4x128xbf16> to vector<4x1x128xbf16>
    %141 = vector.shape_cast %25 : vector<4x128xbf16> to vector<1x4x128xbf16>
    %142 = vector.broadcast %140 : vector<4x1x128xbf16> to vector<4x4x128xbf16>
    %143 = vector.broadcast %141 : vector<1x4x128xbf16> to vector<4x4x128xbf16>
    %144 = arith.mulf %142, %143 : vector<4x4x128xbf16>
    %145 = vector.shape_cast %144 : vector<4x4x128xbf16> to vector<16x128xbf16>
    %cst_45 = arith.constant dense<0.000000e+00> : vector<8x128xf32>
    %146 = tpu.matmul %32, %145, %cst_45 {dimension_numbers = #tpu.dot_dimension_numbers<[1], [0], [0], [1], [0, 0, 1, 1], [], []>} : vector<8x16xbf16>, vector<16x128xbf16>, vector<8x128xf32> -> vector<8x128xf32>
    %147 = arith.addf %138, %146 : vector<8x128xf32>
    %148 = arith.truncf %146 : vector<8x128xf32> to vector<8x128xbf16>
    %149 = vector.shape_cast %27 : vector<4x128xbf16> to vector<4x1x128xbf16>
    %150 = vector.shape_cast %27 : vector<4x128xbf16> to vector<1x4x128xbf16>
    %151 = vector.broadcast %149 : vector<4x1x128xbf16> to vector<4x4x128xbf16>
    %152 = vector.broadcast %150 : vector<1x4x128xbf16> to vector<4x4x128xbf16>
    %153 = arith.mulf %151, %152 : vector<4x4x128xbf16>
    %154 = vector.shape_cast %153 : vector<4x4x128xbf16> to vector<16x128xbf16>
    %cst_46 = arith.constant dense<0.000000e+00> : vector<8x128xf32>
    %155 = tpu.matmul %32, %154, %cst_46 {dimension_numbers = #tpu.dot_dimension_numbers<[1], [0], [0], [1], [0, 0, 1, 1], [], []>} : vector<8x16xbf16>, vector<16x128xbf16>, vector<8x128xf32> -> vector<8x128xf32>
    %156 = arith.addf %147, %155 : vector<8x128xf32>
    %157 = arith.truncf %155 : vector<8x128xf32> to vector<8x128xbf16>
    %158 = vector.shape_cast %29 : vector<4x128xbf16> to vector<4x1x128xbf16>
    %159 = vector.shape_cast %29 : vector<4x128xbf16> to vector<1x4x128xbf16>
    %160 = vector.broadcast %158 : vector<4x1x128xbf16> to vector<4x4x128xbf16>
    %161 = vector.broadcast %159 : vector<1x4x128xbf16> to vector<4x4x128xbf16>
    %162 = arith.mulf %160, %161 : vector<4x4x128xbf16>
    %163 = vector.shape_cast %162 : vector<4x4x128xbf16> to vector<16x128xbf16>
    %cst_47 = arith.constant dense<0.000000e+00> : vector<8x128xf32>
    %164 = tpu.matmul %32, %163, %cst_47 {dimension_numbers = #tpu.dot_dimension_numbers<[1], [0], [0], [1], [0, 0, 1, 1], [], []>} : vector<8x16xbf16>, vector<16x128xbf16>, vector<8x128xf32> -> vector<8x128xf32>
    %165 = arith.addf %156, %164 : vector<8x128xf32>
    %166 = arith.truncf %164 : vector<8x128xf32> to vector<8x128xbf16>
    %167 = vector.shape_cast %31 : vector<4x128xbf16> to vector<4x1x128xbf16>
    %168 = vector.shape_cast %31 : vector<4x128xbf16> to vector<1x4x128xbf16>
    %169 = vector.broadcast %167 : vector<4x1x128xbf16> to vector<4x4x128xbf16>
    %170 = vector.broadcast %168 : vector<1x4x128xbf16> to vector<4x4x128xbf16>
    %171 = arith.mulf %169, %170 : vector<4x4x128xbf16>
    %172 = vector.shape_cast %171 : vector<4x4x128xbf16> to vector<16x128xbf16>
    %cst_48 = arith.constant dense<0.000000e+00> : vector<8x128xf32>
    %173 = tpu.matmul %32, %172, %cst_48 {dimension_numbers = #tpu.dot_dimension_numbers<[1], [0], [0], [1], [0, 0, 1, 1], [], []>} : vector<8x16xbf16>, vector<16x128xbf16>, vector<8x128xf32> -> vector<8x128xf32>
    %174 = arith.addf %165, %173 : vector<8x128xf32>
    %175 = arith.truncf %173 : vector<8x128xf32> to vector<8x128xbf16>
    %cst_49 = arith.constant 0.000000e+00 : f32
    %176 = vector.broadcast %cst_49 : f32 to vector<8x128xf32>
    %177 = arith.maximumf %174, %176 : vector<8x128xf32>
    %c0_50 = arith.constant 0 : index
    %c0_51 = arith.constant 0 : index
    %178 = vector.load %arg3[%c0_50, %c0_51] : memref<8x32xbf16, #tpu.memory_space<vmem>>, vector<8x32xbf16>
    %179 = vector.shape_cast %1 : vector<4x128xbf16> to vector<4x1x128xbf16>
    %180 = vector.shape_cast %40 : vector<8x128xbf16> to vector<1x8x128xbf16>
    %181 = vector.broadcast %179 : vector<4x1x128xbf16> to vector<4x8x128xbf16>
    %182 = vector.broadcast %180 : vector<1x8x128xbf16> to vector<4x8x128xbf16>
    %183 = arith.mulf %181, %182 : vector<4x8x128xbf16>
    %184 = vector.shape_cast %183 : vector<4x8x128xbf16> to vector<32x128xbf16>
    %cst_52 = arith.constant dense<0.000000e+00> : vector<8x128xf32>
    %185 = tpu.matmul %178, %184, %cst_52 {dimension_numbers = #tpu.dot_dimension_numbers<[1], [0], [0], [1], [0, 0, 1, 1], [], []>} : vector<8x32xbf16>, vector<32x128xbf16>, vector<8x128xf32> -> vector<8x128xf32>
    %186 = vector.shape_cast %3 : vector<4x128xbf16> to vector<4x1x128xbf16>
    %187 = vector.shape_cast %49 : vector<8x128xbf16> to vector<1x8x128xbf16>
    %188 = vector.broadcast %186 : vector<4x1x128xbf16> to vector<4x8x128xbf16>
    %189 = vector.broadcast %187 : vector<1x8x128xbf16> to vector<4x8x128xbf16>
    %190 = arith.mulf %188, %189 : vector<4x8x128xbf16>
    %191 = vector.shape_cast %190 : vector<4x8x128xbf16> to vector<32x128xbf16>
    %cst_53 = arith.constant dense<0.000000e+00> : vector<8x128xf32>
    %192 = tpu.matmul %178, %191, %cst_53 {dimension_numbers = #tpu.dot_dimension_numbers<[1], [0], [0], [1], [0, 0, 1, 1], [], []>} : vector<8x32xbf16>, vector<32x128xbf16>, vector<8x128xf32> -> vector<8x128xf32>
    %193 = arith.addf %185, %192 : vector<8x128xf32>
    %194 = vector.shape_cast %5 : vector<4x128xbf16> to vector<4x1x128xbf16>
    %195 = vector.shape_cast %58 : vector<8x128xbf16> to vector<1x8x128xbf16>
    %196 = vector.broadcast %194 : vector<4x1x128xbf16> to vector<4x8x128xbf16>
    %197 = vector.broadcast %195 : vector<1x8x128xbf16> to vector<4x8x128xbf16>
    %198 = arith.mulf %196, %197 : vector<4x8x128xbf16>
    %199 = vector.shape_cast %198 : vector<4x8x128xbf16> to vector<32x128xbf16>
    %cst_54 = arith.constant dense<0.000000e+00> : vector<8x128xf32>
    %200 = tpu.matmul %178, %199, %cst_54 {dimension_numbers = #tpu.dot_dimension_numbers<[1], [0], [0], [1], [0, 0, 1, 1], [], []>} : vector<8x32xbf16>, vector<32x128xbf16>, vector<8x128xf32> -> vector<8x128xf32>
    %201 = arith.addf %193, %200 : vector<8x128xf32>
    %202 = vector.shape_cast %7 : vector<4x128xbf16> to vector<4x1x128xbf16>
    %203 = vector.shape_cast %67 : vector<8x128xbf16> to vector<1x8x128xbf16>
    %204 = vector.broadcast %202 : vector<4x1x128xbf16> to vector<4x8x128xbf16>
    %205 = vector.broadcast %203 : vector<1x8x128xbf16> to vector<4x8x128xbf16>
    %206 = arith.mulf %204, %205 : vector<4x8x128xbf16>
    %207 = vector.shape_cast %206 : vector<4x8x128xbf16> to vector<32x128xbf16>
    %cst_55 = arith.constant dense<0.000000e+00> : vector<8x128xf32>
    %208 = tpu.matmul %178, %207, %cst_55 {dimension_numbers = #tpu.dot_dimension_numbers<[1], [0], [0], [1], [0, 0, 1, 1], [], []>} : vector<8x32xbf16>, vector<32x128xbf16>, vector<8x128xf32> -> vector<8x128xf32>
    %209 = arith.addf %201, %208 : vector<8x128xf32>
    %210 = vector.shape_cast %9 : vector<4x128xbf16> to vector<4x1x128xbf16>
    %211 = vector.shape_cast %76 : vector<8x128xbf16> to vector<1x8x128xbf16>
    %212 = vector.broadcast %210 : vector<4x1x128xbf16> to vector<4x8x128xbf16>
    %213 = vector.broadcast %211 : vector<1x8x128xbf16> to vector<4x8x128xbf16>
    %214 = arith.mulf %212, %213 : vector<4x8x128xbf16>
    %215 = vector.shape_cast %214 : vector<4x8x128xbf16> to vector<32x128xbf16>
    %cst_56 = arith.constant dense<0.000000e+00> : vector<8x128xf32>
    %216 = tpu.matmul %178, %215, %cst_56 {dimension_numbers = #tpu.dot_dimension_numbers<[1], [0], [0], [1], [0, 0, 1, 1], [], []>} : vector<8x32xbf16>, vector<32x128xbf16>, vector<8x128xf32> -> vector<8x128xf32>
    %217 = arith.addf %209, %216 : vector<8x128xf32>
    %218 = vector.shape_cast %11 : vector<4x128xbf16> to vector<4x1x128xbf16>
    %219 = vector.shape_cast %85 : vector<8x128xbf16> to vector<1x8x128xbf16>
    %220 = vector.broadcast %218 : vector<4x1x128xbf16> to vector<4x8x128xbf16>
    %221 = vector.broadcast %219 : vector<1x8x128xbf16> to vector<4x8x128xbf16>
    %222 = arith.mulf %220, %221 : vector<4x8x128xbf16>
    %223 = vector.shape_cast %222 : vector<4x8x128xbf16> to vector<32x128xbf16>
    %cst_57 = arith.constant dense<0.000000e+00> : vector<8x128xf32>
    %224 = tpu.matmul %178, %223, %cst_57 {dimension_numbers = #tpu.dot_dimension_numbers<[1], [0], [0], [1], [0, 0, 1, 1], [], []>} : vector<8x32xbf16>, vector<32x128xbf16>, vector<8x128xf32> -> vector<8x128xf32>
    %225 = arith.addf %217, %224 : vector<8x128xf32>
    %226 = vector.shape_cast %13 : vector<4x128xbf16> to vector<4x1x128xbf16>
    %227 = vector.shape_cast %94 : vector<8x128xbf16> to vector<1x8x128xbf16>
    %228 = vector.broadcast %226 : vector<4x1x128xbf16> to vector<4x8x128xbf16>
    %229 = vector.broadcast %227 : vector<1x8x128xbf16> to vector<4x8x128xbf16>
    %230 = arith.mulf %228, %229 : vector<4x8x128xbf16>
    %231 = vector.shape_cast %230 : vector<4x8x128xbf16> to vector<32x128xbf16>
    %cst_58 = arith.constant dense<0.000000e+00> : vector<8x128xf32>
    %232 = tpu.matmul %178, %231, %cst_58 {dimension_numbers = #tpu.dot_dimension_numbers<[1], [0], [0], [1], [0, 0, 1, 1], [], []>} : vector<8x32xbf16>, vector<32x128xbf16>, vector<8x128xf32> -> vector<8x128xf32>
    %233 = arith.addf %225, %232 : vector<8x128xf32>
    %234 = vector.shape_cast %15 : vector<4x128xbf16> to vector<4x1x128xbf16>
    %235 = vector.shape_cast %103 : vector<8x128xbf16> to vector<1x8x128xbf16>
    %236 = vector.broadcast %234 : vector<4x1x128xbf16> to vector<4x8x128xbf16>
    %237 = vector.broadcast %235 : vector<1x8x128xbf16> to vector<4x8x128xbf16>
    %238 = arith.mulf %236, %237 : vector<4x8x128xbf16>
    %239 = vector.shape_cast %238 : vector<4x8x128xbf16> to vector<32x128xbf16>
    %cst_59 = arith.constant dense<0.000000e+00> : vector<8x128xf32>
    %240 = tpu.matmul %178, %239, %cst_59 {dimension_numbers = #tpu.dot_dimension_numbers<[1], [0], [0], [1], [0, 0, 1, 1], [], []>} : vector<8x32xbf16>, vector<32x128xbf16>, vector<8x128xf32> -> vector<8x128xf32>
    %241 = arith.addf %233, %240 : vector<8x128xf32>
    %242 = vector.shape_cast %17 : vector<4x128xbf16> to vector<4x1x128xbf16>
    %243 = vector.shape_cast %112 : vector<8x128xbf16> to vector<1x8x128xbf16>
    %244 = vector.broadcast %242 : vector<4x1x128xbf16> to vector<4x8x128xbf16>
    %245 = vector.broadcast %243 : vector<1x8x128xbf16> to vector<4x8x128xbf16>
    %246 = arith.mulf %244, %245 : vector<4x8x128xbf16>
    %247 = vector.shape_cast %246 : vector<4x8x128xbf16> to vector<32x128xbf16>
    %cst_60 = arith.constant dense<0.000000e+00> : vector<8x128xf32>
    %248 = tpu.matmul %178, %247, %cst_60 {dimension_numbers = #tpu.dot_dimension_numbers<[1], [0], [0], [1], [0, 0, 1, 1], [], []>} : vector<8x32xbf16>, vector<32x128xbf16>, vector<8x128xf32> -> vector<8x128xf32>
    %249 = arith.addf %241, %248 : vector<8x128xf32>
    %250 = vector.shape_cast %19 : vector<4x128xbf16> to vector<4x1x128xbf16>
    %251 = vector.shape_cast %121 : vector<8x128xbf16> to vector<1x8x128xbf16>
    %252 = vector.broadcast %250 : vector<4x1x128xbf16> to vector<4x8x128xbf16>
    %253 = vector.broadcast %251 : vector<1x8x128xbf16> to vector<4x8x128xbf16>
    %254 = arith.mulf %252, %253 : vector<4x8x128xbf16>
    %255 = vector.shape_cast %254 : vector<4x8x128xbf16> to vector<32x128xbf16>
    %cst_61 = arith.constant dense<0.000000e+00> : vector<8x128xf32>
    %256 = tpu.matmul %178, %255, %cst_61 {dimension_numbers = #tpu.dot_dimension_numbers<[1], [0], [0], [1], [0, 0, 1, 1], [], []>} : vector<8x32xbf16>, vector<32x128xbf16>, vector<8x128xf32> -> vector<8x128xf32>
    %257 = arith.addf %249, %256 : vector<8x128xf32>
    %258 = vector.shape_cast %21 : vector<4x128xbf16> to vector<4x1x128xbf16>
    %259 = vector.shape_cast %130 : vector<8x128xbf16> to vector<1x8x128xbf16>
    %260 = vector.broadcast %258 : vector<4x1x128xbf16> to vector<4x8x128xbf16>
    %261 = vector.broadcast %259 : vector<1x8x128xbf16> to vector<4x8x128xbf16>
    %262 = arith.mulf %260, %261 : vector<4x8x128xbf16>
    %263 = vector.shape_cast %262 : vector<4x8x128xbf16> to vector<32x128xbf16>
    %cst_62 = arith.constant dense<0.000000e+00> : vector<8x128xf32>
    %264 = tpu.matmul %178, %263, %cst_62 {dimension_numbers = #tpu.dot_dimension_numbers<[1], [0], [0], [1], [0, 0, 1, 1], [], []>} : vector<8x32xbf16>, vector<32x128xbf16>, vector<8x128xf32> -> vector<8x128xf32>
    %265 = arith.addf %257, %264 : vector<8x128xf32>
    %266 = vector.shape_cast %23 : vector<4x128xbf16> to vector<4x1x128xbf16>
    %267 = vector.shape_cast %139 : vector<8x128xbf16> to vector<1x8x128xbf16>
    %268 = vector.broadcast %266 : vector<4x1x128xbf16> to vector<4x8x128xbf16>
    %269 = vector.broadcast %267 : vector<1x8x128xbf16> to vector<4x8x128xbf16>
    %270 = arith.mulf %268, %269 : vector<4x8x128xbf16>
    %271 = vector.shape_cast %270 : vector<4x8x128xbf16> to vector<32x128xbf16>
    %cst_63 = arith.constant dense<0.000000e+00> : vector<8x128xf32>
    %272 = tpu.matmul %178, %271, %cst_63 {dimension_numbers = #tpu.dot_dimension_numbers<[1], [0], [0], [1], [0, 0, 1, 1], [], []>} : vector<8x32xbf16>, vector<32x128xbf16>, vector<8x128xf32> -> vector<8x128xf32>
    %273 = arith.addf %265, %272 : vector<8x128xf32>
    %274 = vector.shape_cast %25 : vector<4x128xbf16> to vector<4x1x128xbf16>
    %275 = vector.shape_cast %148 : vector<8x128xbf16> to vector<1x8x128xbf16>
    %276 = vector.broadcast %274 : vector<4x1x128xbf16> to vector<4x8x128xbf16>
    %277 = vector.broadcast %275 : vector<1x8x128xbf16> to vector<4x8x128xbf16>
    %278 = arith.mulf %276, %277 : vector<4x8x128xbf16>
    %279 = vector.shape_cast %278 : vector<4x8x128xbf16> to vector<32x128xbf16>
    %cst_64 = arith.constant dense<0.000000e+00> : vector<8x128xf32>
    %280 = tpu.matmul %178, %279, %cst_64 {dimension_numbers = #tpu.dot_dimension_numbers<[1], [0], [0], [1], [0, 0, 1, 1], [], []>} : vector<8x32xbf16>, vector<32x128xbf16>, vector<8x128xf32> -> vector<8x128xf32>
    %281 = arith.addf %273, %280 : vector<8x128xf32>
    %282 = vector.shape_cast %27 : vector<4x128xbf16> to vector<4x1x128xbf16>
    %283 = vector.shape_cast %157 : vector<8x128xbf16> to vector<1x8x128xbf16>
    %284 = vector.broadcast %282 : vector<4x1x128xbf16> to vector<4x8x128xbf16>
    %285 = vector.broadcast %283 : vector<1x8x128xbf16> to vector<4x8x128xbf16>
    %286 = arith.mulf %284, %285 : vector<4x8x128xbf16>
    %287 = vector.shape_cast %286 : vector<4x8x128xbf16> to vector<32x128xbf16>
    %cst_65 = arith.constant dense<0.000000e+00> : vector<8x128xf32>
    %288 = tpu.matmul %178, %287, %cst_65 {dimension_numbers = #tpu.dot_dimension_numbers<[1], [0], [0], [1], [0, 0, 1, 1], [], []>} : vector<8x32xbf16>, vector<32x128xbf16>, vector<8x128xf32> -> vector<8x128xf32>
    %289 = arith.addf %281, %288 : vector<8x128xf32>
    %290 = vector.shape_cast %29 : vector<4x128xbf16> to vector<4x1x128xbf16>
    %291 = vector.shape_cast %166 : vector<8x128xbf16> to vector<1x8x128xbf16>
    %292 = vector.broadcast %290 : vector<4x1x128xbf16> to vector<4x8x128xbf16>
    %293 = vector.broadcast %291 : vector<1x8x128xbf16> to vector<4x8x128xbf16>
    %294 = arith.mulf %292, %293 : vector<4x8x128xbf16>
    %295 = vector.shape_cast %294 : vector<4x8x128xbf16> to vector<32x128xbf16>
    %cst_66 = arith.constant dense<0.000000e+00> : vector<8x128xf32>
    %296 = tpu.matmul %178, %295, %cst_66 {dimension_numbers = #tpu.dot_dimension_numbers<[1], [0], [0], [1], [0, 0, 1, 1], [], []>} : vector<8x32xbf16>, vector<32x128xbf16>, vector<8x128xf32> -> vector<8x128xf32>
    %297 = arith.addf %289, %296 : vector<8x128xf32>
    %298 = vector.shape_cast %31 : vector<4x128xbf16> to vector<4x1x128xbf16>
    %299 = vector.shape_cast %175 : vector<8x128xbf16> to vector<1x8x128xbf16>
    %300 = vector.broadcast %298 : vector<4x1x128xbf16> to vector<4x8x128xbf16>
    %301 = vector.broadcast %299 : vector<1x8x128xbf16> to vector<4x8x128xbf16>
    %302 = arith.mulf %300, %301 : vector<4x8x128xbf16>
    %303 = vector.shape_cast %302 : vector<4x8x128xbf16> to vector<32x128xbf16>
    %cst_67 = arith.constant dense<0.000000e+00> : vector<8x128xf32>
    %304 = tpu.matmul %178, %303, %cst_67 {dimension_numbers = #tpu.dot_dimension_numbers<[1], [0], [0], [1], [0, 0, 1, 1], [], []>} : vector<8x32xbf16>, vector<32x128xbf16>, vector<8x128xf32> -> vector<8x128xf32>
    %305 = arith.addf %297, %304 : vector<8x128xf32>
    %cst_68 = arith.constant 0.000000e+00 : f32
    %306 = vector.broadcast %cst_68 : f32 to vector<8x128xf32>
    %307 = arith.maximumf %305, %306 : vector<8x128xf32>
    %308 = tpu.concatenate %177, %307 in 0 : vector<8x128xf32>, vector<8x128xf32> -> vector<16x128xf32>
    %c0_69 = arith.constant 0 : index
    %c0_70 = arith.constant 0 : index
    %309 = vector.load %arg4[%c0_69, %c0_70] : memref<1x16xf32, #tpu.memory_space<vmem>>, vector<1x16xf32>
    %cst_71 = arith.constant dense<0.000000e+00> : vector<1x128xf32>
    %310 = tpu.matmul %309, %308, %cst_71 {dimension_numbers = #tpu.dot_dimension_numbers<[1], [0], [0], [1], [0, 0, 1, 1], [], []>} : vector<1x16xf32>, vector<16x128xf32>, vector<1x128xf32> -> vector<1x128xf32>
    %c0_72 = arith.constant 0 : index
    %311 = memref.load %arg5[%c0_72] : memref<1xf32, #tpu.memory_space<smem>>
    %312 = vector.broadcast %311 : f32 to vector<1x128xf32>
    %313 = arith.addf %310, %312 : vector<1x128xf32>
    %314 = arith.negf %313 : vector<1x128xf32>
    %315 = math.exp %314 : vector<1x128xf32>
    %cst_73 = arith.constant 1.000000e+00 : f32
    %316 = vector.broadcast %cst_73 : f32 to vector<1x128xf32>
    %317 = arith.addf %316, %315 : vector<1x128xf32>
    %318 = arith.divf %316, %317 : vector<1x128xf32>
    %c0_74 = arith.constant 0 : index
    %c0_75 = arith.constant 0 : index
    %319 = vector.load %arg6[%c0_74, %c0_75] : memref<1x128xf32, #tpu.memory_space<vmem>>, vector<1x128xf32>
    tpu.vector_store %arg6[%c0_74, %c0_75], %318 {strides = array<i32>} : memref<1x128xf32, #tpu.memory_space<vmem>>, vector<1x128xf32>,
    return
  }
  func.func @transform_0(%arg0: i32) -> (i32, i32, i32) {
    %c0_i32 = arith.constant 0 : i32
    %c0_i32_0 = arith.constant 0 : i32
    %c0_i32_1 = arith.constant 0 : i32
    return %c0_i32, %c0_i32_0, %arg0 : i32, i32, i32
  }
  func.func @transform_1(%arg0: i32) -> (i32, i32) {
    %c0_i32 = arith.constant 0 : i32
    %c0_i32_0 = arith.constant 0 : i32
    %c0_i32_1 = arith.constant 0 : i32
    return %c0_i32, %c0_i32_0 : i32, i32
  }
  func.func @transform_2(%arg0: i32) -> (i32, i32) {
    %c0_i32 = arith.constant 0 : i32
    %c0_i32_0 = arith.constant 0 : i32
    %c0_i32_1 = arith.constant 0 : i32
    return %c0_i32, %c0_i32_0 : i32, i32
  }
  func.func @transform_3(%arg0: i32) -> (i32, i32) {
    %c0_i32 = arith.constant 0 : i32
    %c0_i32_0 = arith.constant 0 : i32
    %c0_i32_1 = arith.constant 0 : i32
    return %c0_i32, %c0_i32_0 : i32, i32
  }
  func.func @transform_4(%arg0: i32) -> i32 {
    %c0_i32 = arith.constant 0 : i32
    %c0_i32_0 = arith.constant 0 : i32
    return %c0_i32 : i32
  }
  func.func @transform_5(%arg0: i32) -> (i32, i32) {
    %c0_i32 = arith.constant 0 : i32
    %c0_i32_0 = arith.constant 0 : i32
    return %c0_i32, %arg0 : i32, i32
  }
}

</mosaic_0001>

<bundles_post_ra>
// kernel: cin_pallas_forward.1
= control target key start
LH: loop header
LB: loop body
LE: loop exit
PB: predicated region body
PF: predicated region fallthrough
CT: control target
= control target key end

     0   :  { %s5090_s0 = inlined_call_operand.hbm [shape: bf16[16,4,256], index: 0, kind: input, shape index: {}]   ;;  %s5091_s1 = inlined_call_operand.vmem [shape: bf16[8,16], index: 1, kind: input, shape index: {}]   ;;  %s5092_s2 = inlined_call_operand.vmem [shape: bf16[8,32], index: 2, kind: input, shape index: {}]   ;;  %s5093_s3 = inlined_call_operand.vmem [shape: f32[1,16], index: 3, kind: input, shape index: {}]   ;;  %s5094_s4 = inlined_call_operand.<no memory space> [shape: f32[1], index: 4, kind: input, shape index: {}]   ;;  %s5095_s5 = inlined_call_operand.hbm [shape: f32[1,256], index: 5, kind: output, shape index: {}]  }
   0x1   :  { %10 = sst [smem:[#allocation2]] %s5094_s4 }
   0x2   :  { %11 = vsyncpa [#allocation4], 0 }
   0x3   :  { %13 = vsyncpa [#allocation4 + $0x1], 0 }
   0x4   :  { %14 = vsyncpa [#allocation5], 0 }
   0x5   :  { %16 = vsyncpa [#allocation5 + $0x1], 0  ;;  %s4120_s20 = smov 0   ;;  %s4122_s21 = smov 0  }
   0x6   :  { %s4124_s22 = smov 0   ;;  %s4126_s23 = smov 0  }
   0x7 LB: > { %s4141_s4 = sadd.s32 4294967295, %s4075_s23   ;;  %s3421_s24 = sadd.s32 4294967294, %s4075_s23   ;;  %s4075_s23 = sphi %s4126_s23, %s5178_s23   ;;  %s4071_s22 = sphi %s4124_s22, %s5177_s22   ;;  %s4067_s21 = sphi %s4122_s21, %s5176_s21   ;;  %s4063_s20 = sphi %s4120_s20, %s5175_s20  }
   0x8   : > { %s4145_s25 = sadd.s32 1, %s4075_s23   ;;  %s29_s26 = sadd.s32 1, %s4071_s22 }
   0x9   : > { %s26_s27 = ssub.s32 %s4075_s23, %s4145_s25  ;;  %p36_p0 = scmp.ne.s32.totalorder %s4071_s22, %s4067_s21 }
   0xa   : > { %p27_p1 = scmp.eq.s32.totalorder %s26_s27, 0  ;;  %p37_p2 = scmp.eq.s32.totalorder %s4075_s23, 0 }
   0xb   : > { %p42_p3 = scmp.ne.s32.totalorder %s4067_s21, %s4063_s20  ;;  %p43_p4 = scmp.eq.s32.totalorder %s4141_s4, 0 }
   0xc   : > { %s4157_s28 = scalar_select %p27_p1, %s4071_s22, %s29_s26  }
   0xd   : > { %p4159_p5 = por %p37_p2, %p36_p0  ;;  %p4163_p6 = por %p43_p4, %p42_p3 }
   0xe   : > { %p150_p7 = scmp.eq.s32.totalorder %s4141_s4, 1  ;;  %p156_p8 = scmp.eq.s32.totalorder %s3421_s24, 1 }
   0xf   : > { %p3933_p10 = scmp.lt.s32.totalorder %s4075_s23, 2  ;;  %s188_s8 = sand.u32 1, %s4071_s22  }
  0x10   : > { %p4170_p11 = por %p150_p7, %p36_p0  ;;  %p4174_p12 = por %p156_p8, %p42_p3 }
  0x11   : > { %s3425_s9 = sshll.u32 %s4075_s23, 5  ;;  %s3424_s10 = sshll.u32 %s188_s8, 5 }
  0x12   : > { %s5123_s6 = scalar_select %p4170_p11, 1, 0 }
  0x13   : > { %s5124_s7 = scalar_select %p4174_p12, 1, 0 }
  0x14   : > { %s4183_s13 = scalar_lea.hbm %s5090_s0, %s3425_s9  ;;  %s192_s14 = scalar_lea.vmem [#allocation3], %s3424_s10 }
  0x15   : > { %s198_s15 = sshll.u32 %s192_s14, 4  ;;  %p4187_p13 = pnand %p3933_p10, %p4159_p5  ;;  %s4191_s15 = int_to_ptr.vmem [resolvable:$true] %s198_s15 }
  0x16   : > { %s4194_s17 = scalar_lea.sflag [#allocation4], %s188_s8  ;;  %s3979_s18 = scalar_lea.hbm %s4183_s13, 512 }
  0x17   : > { %p3980_p1 = scmp.ne.s32.totalorder %s4183_s13, %s3979_s18  ;;  %p3981_p2 = pneg %p4187_p13 }
  0x18   : > { %s3984_s26 = scalar_lea.hbm %s5090_s0, 1024  ;;  %p3985_p5 = scmp.lt.u32.totalorder %s4183_s13, %s5090_s0 }
  0x19   : > { %p3982_p3 = pnand %p3981_p2, %p3980_p1  ;;  %p3986_p7 = scmp.lt.u32.totalorder %s3984_s26, %s3979_s18 }
  0x1a   : > { %p3988_p10 = scmp.lt.u32.totalorder %s3979_s18, %s4183_s13 }
  0x1b   : > { %p3983_p4 = pneg %p3982_p3  ;;  %p3987_p8 = por %p3986_p7, %p3985_p5 }
  0x1d   : > { %p3989_p9 = por %p3988_p10, %p3987_p8 }
  0x1f   : > { %p3990_p0 = pnand %p3989_p9, %p3983_p4 }
  0x21   : > { %3993 = shalt.err (!%p3990_p0)
}
  0x22   : > { %s3994_s8 = scalar_lea.vmem %s4191_s15, 512  ;;  %s4077_s9 = smov [#allocation3]  }
  0x23   : > { %p3995_p1 = scmp.ne.s32.totalorder %s4191_s15, %s3994_s8  ;;  %s3999_s10 = sshll.u32 %s4077_s9, 4  ;;  %s4000_s10 = int_to_ptr.vmem [resolvable:$false] %s3999_s10 }
  0x24   : > { %s4001_s11 = scalar_lea.vmem %s4000_s10, 1024  ;;  %p4002_p11 = scmp.lt.s32.totalorder %s4191_s15, %s4000_s10 }
  0x25   : > { %p3997_p3 = pnand %p3995_p1, %p3981_p2  ;;  %p4003_p5 = scmp.lt.s32.totalorder %s4001_s11, %s3994_s8 }
  0x27   : > { %p3998_p12 = pneg %p3997_p3  ;;  %p4004_p7 = por %p4003_p5, %p4002_p11 }
  0x29   : > { %p4005_p8 = pnand %p4004_p7, %p3998_p12 }
  0x2b   : > { %4008 = shalt.err (!%p4005_p8)
}
  0x2c   : > { %s4078_s12 = smov 64   ;;  %s4079_s14 = smov 32  }
  0x2d   : > { %s4080_s18 = smov 2   ;;  %p206_p9 = scmp.lt.s32.totalorder %s4075_s23, 3 }
  0x2e   : > { %3928 = dma.hbm_to_vmem [thread:$0]  (!%p4187_p13), %s4183_s13, 512, %s4191_s15, %s4194_s17, %s4078_s12, %s4079_s14, %s4080_s18  }
  0x2f   : > { %p5126_p0 = scmp.ge.s32.totalorder %s4075_s23, 1 }
  0x31   : > { %p207_p2 = pnand %p5126_p0, %p206_p9 }
  0x33   : > { %210 = sbr.rel (%p207_p2) target bundleno = 980 (0x3d4), region = 40 }
  0x3a   : > { %s4226_s19 = sand.u32 1, %s4067_s21  }
  0x3b   : > { %s3427_s24 = sshll.u32 %s4226_s19, 5  ;;  %s213_s26 = scalar_lea.sflag [#allocation4], %s4226_s19 }
  0x3c   : > { %s4230_s27 = scalar_lea.vmem [#allocation3], %s3427_s24 }
  0x3d   : > { %4054 = dma.done.wait (%p4163_p6), %s213_s26, 512  }
  0x3e   : > { %4056 = vsyncadd (%p4163_p6), %s213_s26, 4294966784  ;;  %v279_v0 = vlaneseq  ;;  %v5099_v1 = vmov 0.0   ;;  %v4082_v2 = vmov 1966171168   ;;  %v4083_v4 = vmov 1983009808  }
  0x3f   : > { %3627 = vmatprep.subr.bf16.mxu1 %v5099_v1  ;;  %v277_v3 = vunpack.c.l.s4 %v4082_v2  ;;  %v347_v5 = vunpack.c.l.s4 %v4083_v4  ;;  %3723 = vmatprep.subr.bf16.mxu0 %v5099_v1  ;;  %vm4084_vm0 = vmmov 0   ;;  %v4245_v10 = vld [vmem:[%s4230_s27] sm:$0x3]  ;;  %v4250_v12 = vld [vmem:[%s4230_s27 + $0x2] sm:$0x3]  ;;  %vm362_vm1 = vcmask 130048  }
  0x40   : > { %v280_v6 = vshrl.u32 %v279_v0, 7  ;;  %3629 = vmatprep.mubr.msk.bf16.mxu1 %vm4084_vm0, %v5099_v1  ;;  %3727 = vmatprep.mubr.msk.bf16.mxu0 %vm4084_vm0, %v5099_v1  ;;  %v4257_v15 = vld [vmem:[%s4230_s27 + $0x4] sm:$0x3]  ;;  %v4260_v16 = vld [vmem:[%s4230_s27 + $0x6] sm:$0x3]  ;;  %vm2364_vm2 = vcmask 261120  }
  0x41   : > { %v278_v7 = vunpack.c.0.s8 %v277_v3  ;;  %v348_v9 = vunpack.c.0.s8 %v347_v5  ;;  %v4263_v17 = vld [vmem:[%s4230_s27 + $0x8] sm:$0x3]  ;;  %s3260_s8 = sld [smem:[#allocation2]]  ;;  %s3541_s9 = sshll.u32 %s4141_s4, 4 }
  0x42   : > { %v4247_v11 = vsub.s32 0, %v280_v6  ;;  %s241_s10 = scalar_lea.vmem [#allocation6], %s4226_s19  ;;  %s5046_s18 = scalar_lea.hbm %s5095_s5, %s3541_s9 }
  0x43   : > { %v4242_v8 = vsub.s32 %v278_v7, %v280_v6  ;;  %v4265_v18 = vsub.s32 %v348_v9, %v280_v6  ;;  %s3355_s11 = sshll.u32 %s241_s10, 4  ;;  %s3343_s24 = scalar_lea.sflag [#allocation5], %s4226_s19  ;;  %s5048_s11 = int_to_ptr.vmem [resolvable:$true] %s3355_s11 }
  0x44   : > { %s4009_s26 = scalar_lea.vmem %s5048_s11, 16  ;;  %p5172_p11 = scmp.ne.s32.totalorder %s5123_s6, 0 }
  0x45   : > { %v282_v13 = vrot.slane %v4245_v10, %v4242_v8  ;;  %v414_v14 = vrot.slane %v4250_v12, %v4242_v8  ;;  %v543_v19 = vrot.slane %v4257_v15, %v4242_v8  ;;  %v4271_v20 = vrot.slane %v4260_v16, %v4242_v8  ;;  %p4010_p6 = scmp.ne.s32.totalorder %s5048_s11, %s4009_s26  ;;  %s4086_s4 = smov [#allocation6]  }
  0x46   : > { %v4275_v21 = vrot.slane %v4263_v17, %v4242_v8 }
  0x47   : > { %v283_v22 = vcombine.high %v282_v13, %v282_v13  ;;  %v285_v23 = vunpack.i.h.s16 %v282_v13  ;;  %v3443_v24 = vpack.i.b16 %v282_v13, %v282_v13  ;;  %v415_v25 = vcombine.high %v414_v14, %v414_v14  ;;  %p4011_p12 = pnand %p4010_p6, %p5172_p11 }
  0x48   : > { %v417_v26 = vunpack.i.h.s16 %v414_v14  ;;  %v3446_v27 = vpack.i.b16 %v414_v14, %v414_v14  ;;  %v544_v28 = vcombine.high %v543_v19, %v543_v19  ;;  %v546_v29 = vunpack.i.h.s16 %v543_v19 }
  0x49   : > { %v287_v30 = vunpack.i.h.s16 %v283_v22  ;;  %v289_v31 = vpack.i.b16 %v285_v23, %v285_v23  ;;  %v3444_v32 = vpack.i.b16 %v283_v22, %v283_v22  ;;  %v295_v33 = vrot.slane %v3443_v24, %v4247_v11  ;;  %p4012_p13 = pneg %p4011_p12 }
  0x4a   : > { %v419_v34 = vunpack.i.h.s16 %v415_v25  ;;  %v421_v35 = vpack.i.b16 %v417_v26, %v417_v26  ;;  %v3447_v36 = vpack.i.b16 %v415_v25, %v415_v25  ;;  %v427_v37 = vrot.slane %v3446_v27, %v4247_v11 }
  0x4b   : > { %v291_v38 = vpack.i.b16 %v287_v30, %v287_v30  ;;  %v299_v39 = vrot.slane %v289_v31, %v4247_v11  ;;  %v303_v40 = vrot.slane %v3444_v32, %v4247_v11  ;;  %v309_v41 = vpack.i.b16 %v295_v33, %v295_v33 }
  0x4c   : > { %v423_v42 = vpack.i.b16 %v419_v34, %v419_v34  ;;  %v431_v43 = vrot.slane %v421_v35, %v4247_v11  ;;  %v435_v44 = vrot.slane %v3447_v36, %v4247_v11  ;;  %v441_v45 = vpack.i.b16 %v427_v37, %v427_v37 }
  0x4d   : > { %v307_v46 = vrot.slane %v291_v38, %v4247_v11  ;;  %v4285_v47 = vrot.slane %v309_v41, %v4247_v11  ;;  %v316_v48 = vpack.i.b16 %v299_v39, %v299_v39  ;;  %v323_v49 = vpack.i.b16 %v303_v40, %v303_v40 }
  0x4e   : > { %v439_v50 = vrot.slane %v423_v42, %v4247_v11  ;;  %v4289_v51 = vrot.slane %v441_v45, %v4247_v11  ;;  %v448_v52 = vpack.i.b16 %v431_v43, %v431_v43  ;;  %v455_v53 = vpack.i.b16 %v435_v44, %v435_v44 }
  0x4f   : > { %v4292_v54 = vrot.slane %v316_v48, %v4247_v11  ;;  %v4295_v55 = vrot.slane %v323_v49, %v4247_v11  ;;  %v330_v56 = vpack.i.b16 %v307_v46, %v307_v46  ;;  %v336_v57 = vmul.bf16 %v4285_v47, %v4245_v10  ;;  %v4355_v48 = vld [vmem:[%s5091_s1] sm:$0xf] }
  0x50   : > { %v4300_v58 = vrot.slane %v448_v52, %v4247_v11  ;;  %v4303_v59 = vrot.slane %v455_v53, %v4247_v11  ;;  %v462_v60 = vpack.i.b16 %v439_v50, %v439_v50  ;;  %v468_v61 = vmul.bf16 %v4250_v12, %v4289_v51 }
  0x51   : > { %v4308_v62 = vrot.slane %v330_v56, %v4247_v11  ;;  %v337_v63 = vmul.bf16 %v4292_v54, %v4245_v10  ;;  %v338_v0 = vmul.bf16 %v4295_v55, %v4245_v10  ;;  %v548_v2 = vunpack.i.h.s16 %v544_v28 }
  0x52   : > { %v4315_v3 = vrot.slane %v462_v60, %v4247_v11  ;;  %v469_v4 = vmul.bf16 %v4250_v12, %v4300_v58  ;;  %v470_v5 = vmul.bf16 %v4250_v12, %v4303_v59  ;;  %v3449_v6 = vpack.i.b16 %v543_v19, %v543_v19 }
  0x53   : > { %v339_v7 = vmul.bf16 %v4308_v62, %v4245_v10  ;;  %v344_v9 = vcombine.low %v336_v57, %v337_v63  ;;  %v550_v13 = vpack.i.b16 %v546_v29, %v546_v29  ;;  %v3450_v14 = vpack.i.b16 %v544_v28, %v544_v28 }
  0x54   : > { %v471_v22 = vmul.bf16 %v4250_v12, %v4315_v3  ;;  %v476_v23 = vcombine.low %v468_v61, %v469_v4  ;;  %v552_v24 = vpack.i.b16 %v548_v2, %v548_v2  ;;  %v556_v25 = vrot.slane %v3449_v6, %v4247_v11 }
  0x55   : > { %v345_v26 = vcombine.low %v338_v0, %v339_v7  ;;  %v352_v27 = vrot.slane %v344_v9, %v4265_v18  ;;  %v560_v30 = vrot.slane %v550_v13, %v4247_v11  ;;  %v564_v19 = vrot.slane %v3450_v14, %v4247_v11 }
  0x56   : > { %v477_v31 = vcombine.low %v470_v5, %v471_v22  ;;  %v484_v10 = vrot.slane %v476_v23, %v4265_v18  ;;  %v568_v29 = vrot.slane %v552_v24, %v4247_v11  ;;  %v570_v28 = vpack.i.b16 %v556_v25, %v556_v25 }
  0x57   : > { %v359_v32 = vrot.slane %v345_v26, %v4265_v18  ;;  %v577_v12 = vpack.i.b16 %v560_v30, %v560_v30  ;;  %v584_v33 = vpack.i.b16 %v564_v19, %v564_v19  ;;  %v673_v34 = vcombine.high %v4271_v20, %v4271_v20  ;;  %v4390_v19 = vld [vmem:[%s4230_s27 + $0xa] sm:$0x3] }
  0x58   : > { %v491_v35 = vrot.slane %v477_v31, %v4265_v18  ;;  %v4336_v36 = vrot.slane %v570_v28, %v4247_v11  ;;  %v591_v37 = vpack.i.b16 %v568_v29, %v568_v29  ;;  %v675_v38 = vunpack.i.h.s16 %v4271_v20 }
  0x59   : > { %v360_v39 = vcombine.low %v352_v27, %v359_v32  ;;  %v4340_v40 = vrot.slane %v577_v12, %v4247_v11  ;;  %v4343_v41 = vrot.slane %v584_v33, %v4247_v11  ;;  %v677_v42 = vunpack.i.h.s16 %v673_v34  ;;  %v4398_v32 = vld [vmem:[%s4230_s27 + $0xc] sm:$0x3] }
  0x5a   : > { %v492_v43 = vcombine.low %v484_v10, %v491_v35  ;;  %v4346_v44 = vrot.slane %v591_v37, %v4247_v11  ;;  %v597_v45 = vmul.bf16 %v4257_v15, %v4336_v36  ;;  %v3452_v46 = vpack.i.b16 %v4271_v20, %v4271_v20 }
  0x5b   : > { %3628 = vmatpush3.bf16.msra.mxu1 %v360_v39  ;;  %v598_v49 = vmul.bf16 %v4257_v15, %v4340_v40  ;;  %v599_v50 = vmul.bf16 %v4257_v15, %v4343_v41  ;;  %v679_v52 = vpack.i.b16 %v675_v38, %v675_v38  ;;  %v3453_v53 = vpack.i.b16 %v673_v34, %v673_v34 }
  0x5c   : > { %3633 = vmatprep.subr.bf16.mxu1 %v5099_v1  ;;  %v600_v56 = vmul.bf16 %v4257_v15, %v4346_v44  ;;  %v681_v20 = vpack.i.b16 %v677_v42, %v677_v42  ;;  %v685_v57 = vrot.slane %v3452_v46, %v4247_v11  ;;  %v802_v60 = vcombine.high %v4275_v21, %v4275_v21 }
  0x5d   : > { %v605_v61 = vcombine.low %v597_v45, %v598_v49  ;;  %v689_v63 = vrot.slane %v679_v52, %v4247_v11  ;;  %v693_v0 = vrot.slane %v3453_v53, %v4247_v11  ;;  %v804_v2 = vunpack.i.h.s16 %v4275_v21 }
  0x5e   : > { %3630 = vmatmul.mubr.msk.bf16.vlgmr.msra.gmra.mrb[0].mxu1 %vm362_vm1, %v4355_v48  ;;  %v606_v4 = vcombine.low %v599_v50, %v600_v56  ;;  %v697_v5 = vrot.slane %v681_v20, %v4247_v11  ;;  %v699_v15 = vpack.i.b16 %v685_v57, %v685_v57  ;;  %v806_v6 = vunpack.i.h.s16 %v802_v60 }
  0x5f   : > { %3634 = vmatpush3.bf16.msra.mxu1 %v492_v43  ;;  %3635 = vmatprep.mubr.msk.bf16.mxu1 %vm4084_vm0, %v5099_v1  ;;  %v613_v7 = vrot.slane %v605_v61, %v4265_v18  ;;  %v706_v9 = vpack.i.b16 %v689_v63, %v689_v63  ;;  %v713_v13 = vpack.i.b16 %v693_v0, %v693_v0 }
  0x60   : > { %3639 = vmatprep.subr.bf16.mxu1 %v5099_v1  ;;  %v620_v14 = vrot.slane %v606_v4, %v4265_v18  ;;  %v4379_v22 = vrot.slane %v699_v15, %v4247_v11  ;;  %v720_v23 = vpack.i.b16 %v697_v5, %v697_v5  ;;  %v3455_v24 = vpack.i.b16 %v4275_v21, %v4275_v21 }
  0x61   : > { %v4384_v25 = vrot.slane %v706_v9, %v4247_v11  ;;  %v4387_v26 = vrot.slane %v713_v13, %v4247_v11  ;;  %v808_v27 = vpack.i.b16 %v804_v2, %v804_v2  ;;  %v3456_v30 = vpack.i.b16 %v802_v60, %v802_v60 }
  0x62   : > { %v621_v31 = vcombine.low %v613_v7, %v620_v14  ;;  %v4393_v10 = vrot.slane %v720_v23, %v4247_v11  ;;  %v726_v29 = vmul.bf16 %v4260_v16, %v4379_v22  ;;  %v810_v28 = vpack.i.b16 %v806_v6, %v806_v6 }
  0x63   : > { %v727_v21 = vmul.bf16 %v4260_v16, %v4384_v25  ;;  %v728_v12 = vmul.bf16 %v4260_v16, %v4387_v26  ;;  %v814_v33 = vrot.slane %v3455_v24, %v4247_v11  ;;  %v818_v34 = vrot.slane %v808_v27, %v4247_v11 }
  0x64   : > { %v729_v35 = vmul.bf16 %v4260_v16, %v4393_v10  ;;  %v822_v37 = vrot.slane %v3456_v30, %v4247_v11  ;;  %v826_v38 = vrot.slane %v810_v28, %v4247_v11  ;;  %v930_v39 = vrot.slane %v4390_v19, %v4242_v8 }
  0x65   : > { %v734_v42 = vcombine.low %v726_v29, %v727_v21  ;;  %v828_v43 = vpack.i.b16 %v814_v33, %v814_v33  ;;  %v835_v45 = vpack.i.b16 %v818_v34, %v818_v34  ;;  %v1059_v46 = vrot.slane %v4398_v32, %v4242_v8 }
  0x66   : > { %3636 = vmatmul.mubr.msk.bf16.vlgmr.msra.gmra.mrb[4].mxu1 %vm362_vm1, %v4355_v48  ;;  %v735_v49 = vcombine.low %v728_v12, %v729_v35  ;;  %v842_v50 = vpack.i.b16 %v822_v37, %v822_v37  ;;  %v849_v52 = vpack.i.b16 %v826_v38, %v826_v38  ;;  %v931_v16 = vcombine.high %v930_v39, %v930_v39 }
  0x67   : > { %3640 = vmatpush3.bf16.msra.mxu1 %v621_v31  ;;  %3641 = vmatprep.mubr.msk.bf16.mxu1 %vm4084_vm0, %v5099_v1  ;;  %v742_v53 = vrot.slane %v734_v42, %v4265_v18  ;;  %v4420_v56 = vrot.slane %v828_v43, %v4247_v11  ;;  %v4423_v20 = vrot.slane %v835_v45, %v4247_v11  ;;  %v933_v57 = vunpack.i.h.s16 %v930_v39 }
  0x68   : > { %3645 = vmatprep.subr.bf16.mxu1 %v5099_v1  ;;  %v749_v60 = vrot.slane %v735_v49, %v4265_v18  ;;  %v4428_v61 = vrot.slane %v842_v50, %v4247_v11  ;;  %v4431_v63 = vrot.slane %v849_v52, %v4247_v11  ;;  %v935_v0 = vunpack.i.h.s16 %v931_v16  ;;  %v4462_v52 = vld [vmem:[%s4230_s27 + $0xe] sm:$0x3] }
  0x69   : > { %v855_v2 = vmul.bf16 %v4263_v17, %v4420_v56  ;;  %v856_v4 = vmul.bf16 %v4263_v17, %v4423_v20  ;;  %v3458_v5 = vpack.i.b16 %v930_v39, %v930_v39  ;;  %v937_v15 = vpack.i.b16 %v933_v57, %v933_v57 }
  0x6a   : > { %v750_v6 = vcombine.low %v742_v53, %v749_v60  ;;  %v857_v7 = vmul.bf16 %v4263_v17, %v4428_v61  ;;  %v858_v9 = vmul.bf16 %v4263_v17, %v4431_v63  ;;  %v3459_v13 = vpack.i.b16 %v931_v16, %v931_v16 }
  0x6b   : > { %v863_v14 = vcombine.low %v855_v2, %v856_v4  ;;  %v939_v23 = vpack.i.b16 %v935_v0, %v935_v0  ;;  %v943_v24 = vrot.slane %v3458_v5, %v4247_v11  ;;  %v947_v27 = vrot.slane %v937_v15, %v4247_v11  ;;  %v4472_v0 = vld [vmem:[%s4230_s27 + $0x10] sm:$0x3] }
  0x6c   : > { %v864_v30 = vcombine.low %v857_v7, %v858_v9  ;;  %v951_v31 = vrot.slane %v3459_v13, %v4247_v11  ;;  %v1060_v29 = vcombine.high %v1059_v46, %v1059_v46  ;;  %v1062_v28 = vunpack.i.h.s16 %v1059_v46 }
  0x6d   : > { %v871_v21 = vrot.slane %v863_v14, %v4265_v18  ;;  %v955_v12 = vrot.slane %v939_v23, %v4247_v11  ;;  %v957_v33 = vpack.i.b16 %v943_v24, %v943_v24  ;;  %v964_v34 = vpack.i.b16 %v947_v27, %v947_v27 }
  0x6e   : > { %3642 = vmatmul.mubr.msk.bf16.vlgmr.msra.gmra.mrb[8].mxu1 %vm362_vm1, %v4355_v48  ;;  %v878_v17 = vrot.slane %v864_v30, %v4265_v18  ;;  %v971_v35 = vpack.i.b16 %v951_v31, %v951_v31  ;;  %v1064_v37 = vunpack.i.h.s16 %v1060_v29  ;;  %v3461_v38 = vpack.i.b16 %v1059_v46, %v1059_v46 }
  0x6f   : > { %3646 = vmatpush3.bf16.msra.mxu1 %v750_v6  ;;  %3647 = vmatprep.mubr.msk.bf16.mxu1 %vm4084_vm0, %v5099_v1  ;;  %v4452_v39 = vrot.slane %v957_v33, %v4247_v11  ;;  %v4455_v42 = vrot.slane %v964_v34, %v4247_v11  ;;  %v978_v43 = vpack.i.b16 %v955_v12, %v955_v12 }
  0x70   : > { %3651 = vmatprep.subr.bf16.mxu1 %v5099_v1  ;;  %v879_v45 = vcombine.low %v871_v21, %v878_v17  ;;  %v4459_v49 = vrot.slane %v971_v35, %v4247_v11  ;;  %v1066_v50 = vpack.i.b16 %v1062_v28, %v1062_v28  ;;  %v3462_v46 = vpack.i.b16 %v1060_v29, %v1060_v29 }
  0x71   : > { %v4465_v16 = vrot.slane %v978_v43, %v4247_v11  ;;  %v984_v53 = vmul.bf16 %v4390_v19, %v4452_v39  ;;  %v985_v57 = vmul.bf16 %v4390_v19, %v4455_v42  ;;  %v1068_v60 = vpack.i.b16 %v1064_v37, %v1064_v37 }
  0x72   : > { %v986_v2 = vmul.bf16 %v4390_v19, %v4459_v49  ;;  %v1072_v4 = vrot.slane %v3461_v38, %v4247_v11  ;;  %v1076_v5 = vrot.slane %v1066_v50, %v4247_v11  ;;  %v1080_v15 = vrot.slane %v3462_v46, %v4247_v11 }
  0x73   : > { %v987_v6 = vmul.bf16 %v4390_v19, %v4465_v16  ;;  %v992_v7 = vcombine.low %v984_v53, %v985_v57  ;;  %v1084_v9 = vrot.slane %v1068_v60, %v4247_v11  ;;  %v1188_v13 = vrot.slane %v4462_v52, %v4242_v8 }
  0x74   : > { %v1086_v14 = vpack.i.b16 %v1072_v4, %v1072_v4  ;;  %v1093_v23 = vpack.i.b16 %v1076_v5, %v1076_v5  ;;  %v1100_v24 = vpack.i.b16 %v1080_v15, %v1080_v15  ;;  %v1317_v27 = vrot.slane %v4472_v0, %v4242_v8 }
  0x75   : > { %v993_v30 = vcombine.low %v986_v2, %v987_v6  ;;  %v1000_v31 = vrot.slane %v992_v7, %v4265_v18  ;;  %v1107_v29 = vpack.i.b16 %v1084_v9, %v1084_v9  ;;  %v1189_v28 = vcombine.high %v1188_v13, %v1188_v13 }
  0x76   : > { %3648 = vmatmul.mubr.msk.bf16.vlgmr.msra.gmra.mrb[12].mxu1 %vm362_vm1, %v4355_v48  ;;  %v4490_v19 = vrot.slane %v1086_v14, %v4247_v11  ;;  %v4493_v21 = vrot.slane %v1093_v23, %v4247_v11  ;;  %v4496_v12 = vrot.slane %v1100_v24, %v4247_v11  ;;  %v1191_v33 = vunpack.i.h.s16 %v1188_v13 }
  0x77   : > { %3652 = vmatpush3.bf16.msra.mxu1 %v879_v45  ;;  %3653 = vmatprep.mubr.msk.bf16.mxu1 %vm4084_vm0, %v5099_v1  ;;  %v1007_v34 = vrot.slane %v993_v30, %v4265_v18  ;;  %v4502_v17 = vrot.slane %v1107_v29, %v4247_v11  ;;  %v1193_v35 = vunpack.i.h.s16 %v1189_v28  ;;  %v3464_v37 = vpack.i.b16 %v1188_v13, %v1188_v13 }
  0x78   : > { %3657 = vmatprep.subr.bf16.mxu1 %v5099_v1  ;;  %v1113_v38 = vmul.bf16 %v4398_v32, %v4490_v19  ;;  %v1114_v43 = vmul.bf16 %v4398_v32, %v4493_v21  ;;  %v1115_v45 = vmul.bf16 %v4398_v32, %v4496_v12  ;;  %v1195_v50 = vpack.i.b16 %v1191_v33, %v1191_v33 }
  0x79   : > { %v1008_v46 = vcombine.low %v1000_v31, %v1007_v34  ;;  %v1116_v53 = vmul.bf16 %v4398_v32, %v4502_v17  ;;  %v3465_v57 = vpack.i.b16 %v1189_v28, %v1189_v28  ;;  %v1197_v60 = vpack.i.b16 %v1193_v35, %v1193_v35 }
  0x7a   : > { %v1121_v2 = vcombine.low %v1113_v38, %v1114_v43  ;;  %v1201_v4 = vrot.slane %v3464_v37, %v4247_v11  ;;  %v1205_v5 = vrot.slane %v1195_v50, %v4247_v11  ;;  %v1318_v15 = vcombine.high %v1317_v27, %v1317_v27 }
  0x7b   : > { %v1122_v6 = vcombine.low %v1115_v45, %v1116_v53  ;;  %v1209_v7 = vrot.slane %v3465_v57, %v4247_v11  ;;  %v1213_v9 = vrot.slane %v1197_v60, %v4247_v11  ;;  %v1320_v13 = vunpack.i.h.s16 %v1317_v27  ;;  %v4536_v45 = vld [vmem:[%s4230_s27 + $0x12] sm:$0x3]  ;;  %v4545_v60 = vld [vmem:[%s4230_s27 + $0x14] sm:$0x3] }
  0x7c   : > { %v1129_v14 = vrot.slane %v1121_v2, %v4265_v18  ;;  %v1215_v23 = vpack.i.b16 %v1201_v4, %v1201_v4  ;;  %v1222_v24 = vpack.i.b16 %v1205_v5, %v1205_v5  ;;  %v1322_v32 = vunpack.i.h.s16 %v1318_v15 }
  0x7d   : > { %v1136_v30 = vrot.slane %v1122_v6, %v4265_v18  ;;  %v1229_v31 = vpack.i.b16 %v1209_v7, %v1209_v7  ;;  %v1236_v29 = vpack.i.b16 %v1213_v9, %v1213_v9  ;;  %v3467_v28 = vpack.i.b16 %v1317_v27, %v1317_v27 }
  0x7e   : > { %3654 = vmatmul.mubr.msk.bf16.vlgmr.msra.gmra.mrb[16].mxu1 %vm362_vm1, %v4355_v48  ;;  %v4522_v33 = vrot.slane %v1215_v23, %v4247_v11  ;;  %v4525_v34 = vrot.slane %v1222_v24, %v4247_v11  ;;  %v1324_v35 = vpack.i.b16 %v1320_v13, %v1320_v13  ;;  %v3468_v37 = vpack.i.b16 %v1318_v15, %v1318_v15 }
  0x7f   : > { %3658 = vmatpush3.bf16.msra.mxu1 %v1008_v46  ;;  %3659 = vmatprep.mubr.msk.bf16.mxu1 %vm4084_vm0, %v5099_v1  ;;  %v1137_v38 = vcombine.low %v1129_v14, %v1136_v30  ;;  %v4530_v43 = vrot.slane %v1229_v31, %v4247_v11  ;;  %v4533_v27 = vrot.slane %v1236_v29, %v4247_v11 }
  0x80   : > { %3663 = vmatprep.subr.bf16.mxu1 %v5099_v1  ;;  %v1242_v50 = vmul.bf16 %v4462_v52, %v4522_v33  ;;  %v1243_v46 = vmul.bf16 %v4462_v52, %v4525_v34  ;;  %v1326_v53 = vpack.i.b16 %v1322_v32, %v1322_v32  ;;  %v1330_v57 = vrot.slane %v3467_v28, %v4247_v11 }
  0x81   : > { %v1244_v2 = vmul.bf16 %v4462_v52, %v4530_v43  ;;  %v1245_v4 = vmul.bf16 %v4462_v52, %v4533_v27  ;;  %v1334_v5 = vrot.slane %v1324_v35, %v4247_v11  ;;  %v1338_v15 = vrot.slane %v3468_v37, %v4247_v11 }
  0x82   : > { %v1250_v6 = vcombine.low %v1242_v50, %v1243_v46  ;;  %v1342_v7 = vrot.slane %v1326_v53, %v4247_v11  ;;  %v1344_v9 = vpack.i.b16 %v1330_v57, %v1330_v57  ;;  %v1446_v13 = vrot.slane %v4536_v45, %v4242_v8 }
  0x83   : > { %v1251_v14 = vcombine.low %v1244_v2, %v1245_v4  ;;  %v1351_v23 = vpack.i.b16 %v1334_v5, %v1334_v5  ;;  %v1358_v24 = vpack.i.b16 %v1338_v15, %v1338_v15  ;;  %v1575_v32 = vrot.slane %v4545_v60, %v4242_v8 }
  0x84   : > { %v1258_v30 = vrot.slane %v1250_v6, %v4265_v18  ;;  %v4560_v52 = vrot.slane %v1344_v9, %v4247_v11  ;;  %v1365_v31 = vpack.i.b16 %v1342_v7, %v1342_v7  ;;  %v1447_v29 = vcombine.high %v1446_v13, %v1446_v13 }
  0x85   : > { %v1265_v28 = vrot.slane %v1251_v14, %v4265_v18  ;;  %v4564_v35 = vrot.slane %v1351_v23, %v4247_v11  ;;  %v4567_v37 = vrot.slane %v1358_v24, %v4247_v11  ;;  %v1449_v50 = vunpack.i.h.s16 %v1446_v13 }
  0x86   : > { %5127 = vst [vmem:[#allocation9_spill] sm:$0xff] %v4560_v52  ;;  %3660 = vmatmul.mubr.msk.bf16.vlgmr.msra.gmra.mrb[20].mxu1 %vm362_vm1, %v4355_v48  ;;  %v4572_v46 = vrot.slane %v1365_v31, %v4247_v11  ;;  %v1371_v53 = vmul.bf16 %v4472_v0, %v4560_v52  ;;  %v1451_v57 = vunpack.i.h.s16 %v1447_v29  ;;  %v3470_v2 = vpack.i.b16 %v1446_v13, %v1446_v13 }
  0x87   : > { %5128 = vst [vmem:[#allocation10_spill] sm:$0xff] %v4564_v35  ;;  %5129 = vst [vmem:[#allocation11_spill] sm:$0xff] %v4567_v37  ;;  %3664 = vmatpush3.bf16.msra.mxu1 %v1137_v38  ;;  %3665 = vmatprep.mubr.msk.bf16.mxu1 %vm4084_vm0, %v5099_v1  ;;  %v1266_v4 = vcombine.low %v1258_v30, %v1265_v28  ;;  %v1372_v5 = vmul.bf16 %v4472_v0, %v4564_v35  ;;  %v1578_v6 = vunpack.i.h.s16 %v1575_v32 }
  0x88   : > { %5130 = vst [vmem:[#allocation12_spill] sm:$0xff] %v4572_v46  ;;  %v1373_v15 = vmul.bf16 %v4472_v0, %v4567_v37  ;;  %3669 = vmatprep.subr.bf16.mxu1 %v5099_v1  ;;  %v1374_v7 = vmul.bf16 %v4472_v0, %v4572_v46  ;;  %v1453_v9 = vpack.i.b16 %v1449_v50, %v1449_v50 }
  0x89   : > { %v3471_v14 = vpack.i.b16 %v1447_v29, %v1447_v29  ;;  %v1455_v13 = vpack.i.b16 %v1451_v57, %v1451_v57  ;;  %v1379_v38 = vcombine.low %v1371_v53, %v1372_v5  ;;  %v1459_v23 = vrot.slane %v3470_v2, %v4247_v11 }
  0x8a   : > { %v1576_v24 = vcombine.high %v1575_v32, %v1575_v32  ;;  %v3473_v30 = vpack.i.b16 %v1575_v32, %v1575_v32  ;;  %v1380_v31 = vcombine.low %v1373_v15, %v1374_v7  ;;  %v1463_v28 = vrot.slane %v1453_v9, %v4247_v11 }
  0x8b   : > { %v1467_v35 = vrot.slane %v3471_v14, %v4247_v11  ;;  %v1471_v37 = vrot.slane %v1455_v13, %v4247_v11  ;;  %v1387_v1 = vrot.slane %v1379_v38, %v4265_v18  ;;  %v1473_v52 = vpack.i.b16 %v1459_v23, %v1459_v23  ;;  %v4616_v23 = vld [vmem:[%s4230_s27 + $0x18] sm:$0x3] }
  0x8c   : > { %v1580_v0 = vunpack.i.h.s16 %v1576_v24  ;;  %v1582_v50 = vpack.i.b16 %v1578_v6, %v1578_v6  ;;  %v1394_v29 = vrot.slane %v1380_v31, %v4265_v18  ;;  %v1480_v53 = vpack.i.b16 %v1463_v28, %v1463_v28 }
  0x8d   : > { %v1487_v57 = vpack.i.b16 %v1467_v35, %v1467_v35  ;;  %v1494_v2 = vpack.i.b16 %v1471_v37, %v1471_v37  ;;  %v4592_v32 = vrot.slane %v1473_v52, %v4247_v11  ;;  %v3474_v5 = vpack.i.b16 %v1576_v24, %v1576_v24  ;;  %v4607_v37 = vld [vmem:[%s4230_s27 + $0x16] sm:$0x3] }
  0x8e   : > { %v1584_v15 = vpack.i.b16 %v1580_v0, %v1580_v0  ;;  %v1588_v7 = vrot.slane %v3473_v30, %v4247_v11  ;;  %3666 = vmatmul.mubr.msk.bf16.vlgmr.msra.gmra.mrb[24].mxu1 %vm362_vm1, %v4355_v48  ;;  %v1395_v9 = vcombine.low %v1387_v1, %v1394_v29  ;;  %v4598_v14 = vrot.slane %v1480_v53, %v4247_v11 }
  0x8f   : > { %5131 = vst [vmem:[#allocation13_spill] sm:$0xff] %v4592_v32  ;;  %v4601_v6 = vrot.slane %v1487_v57, %v4247_v11  ;;  %v4604_v35 = vrot.slane %v1494_v2, %v4247_v11  ;;  %3670 = vmatpush3.bf16.msra.mxu1 %v1266_v4  ;;  %v5135_v52 = vmov 0.0   ;;  %v1500_v13 = vmul.bf16 %v4536_v45, %v4592_v32 }
  0x90   : > { %5132 = vst [vmem:[#allocation14_spill] sm:$0xff] %v4598_v14  ;;  %3671 = vmatprep.mubr.msk.bf16.mxu1 %vm4084_vm0, %v5135_v52  ;;  %v1592_v1 = vrot.slane %v1582_v50, %v4247_v11  ;;  %v1596_v38 = vrot.slane %v3474_v5, %v4247_v11  ;;  %3675 = vmatprep.subr.bf16.mxu1 %v5135_v52 }
  0x91   : > { %5133 = vst [vmem:[#allocation15_spill] sm:$0xff] %v4601_v6  ;;  %5134 = vst [vmem:[#allocation16_spill] sm:$0xff] %v4604_v35  ;;  %v1501_v24 = vmul.bf16 %v4536_v45, %v4598_v14  ;;  %v1502_v4 = vmul.bf16 %v4536_v45, %v4601_v6  ;;  %v1503_v30 = vmul.bf16 %v4536_v45, %v4604_v35 }
  0x92   : > { %v1600_v31 = vrot.slane %v1584_v15, %v4247_v11  ;;  %v1602_v28 = vpack.i.b16 %v1588_v7, %v1588_v7  ;;  %v1609_v0 = vpack.i.b16 %v1592_v1, %v1592_v1  ;;  %v1616_v50 = vpack.i.b16 %v1596_v38, %v1596_v38 }
  0x93   : > { %v1704_v29 = vrot.slane %v4607_v37, %v4242_v8  ;;  %v1508_v53 = vcombine.low %v1500_v13, %v1501_v24  ;;  %v1509_v57 = vcombine.low %v1502_v4, %v1503_v30  ;;  %v1833_v5 = vrot.slane %v4616_v23, %v4242_v8 }
  0x94   : > { %v1623_v2 = vpack.i.b16 %v1600_v31, %v1600_v31  ;;  %v4631_v14 = vrot.slane %v1602_v28, %v4247_v11  ;;  %v4634_v6 = vrot.slane %v1609_v0, %v4247_v11  ;;  %v4637_v45 = vrot.slane %v1616_v50, %v4247_v11 }
  0x95   : > { %v1705_v15 = vcombine.high %v1704_v29, %v1704_v29  ;;  %v1516_v7 = vrot.slane %v1508_v53, %v4265_v18  ;;  %v1523_v1 = vrot.slane %v1509_v57, %v4265_v18  ;;  %v1707_v38 = vunpack.i.h.s16 %v1704_v29 }
  0x96   : > { %5136 = vst [vmem:[#allocation17_spill] sm:$0xff] %v4631_v14  ;;  %5137 = vst [vmem:[#allocation18_spill] sm:$0xff] %v4634_v6  ;;  %v4642_v13 = vrot.slane %v1623_v2, %v4247_v11  ;;  %v1629_v24 = vmul.bf16 %v4545_v60, %v4631_v14  ;;  %v1630_v4 = vmul.bf16 %v4545_v60, %v4634_v6  ;;  %3672 = vmatmul.mubr.msk.bf16.vlgmr.msra.gmra.mrb[28].mxu1 %vm362_vm1, %v4355_v48 }
  0x97   : > { %5138 = vst [vmem:[#allocation19_spill] sm:$0xff] %v4637_v45  ;;  %v1631_v30 = vmul.bf16 %v4545_v60, %v4637_v45  ;;  %v1709_v31 = vunpack.i.h.s16 %v1705_v15  ;;  %v1524_v28 = vcombine.low %v1516_v7, %v1523_v1  ;;  %v3476_v50 = vpack.i.b16 %v1704_v29, %v1704_v29  ;;  %3676 = vmatpush3.bf16.msra.mxu1 %v1395_v9 }
  0x98   : > { %5139 = vst [vmem:[#allocation20_spill] sm:$0xff] %v4642_v13  ;;  %v1632_v0 = vmul.bf16 %v4545_v60, %v4642_v13  ;;  %v1711_v53 = vpack.i.b16 %v1707_v38, %v1707_v38  ;;  %3677 = vmatprep.mubr.msk.bf16.mxu1 %vm4084_vm0, %v5135_v52  ;;  %v1637_v57 = vcombine.low %v1629_v24, %v1630_v4  ;;  %v1836_v14 = vunpack.i.h.s16 %v1833_v5 }
  0x99   : > { %v3477_v2 = vpack.i.b16 %v1705_v15, %v1705_v15  ;;  %v1713_v6 = vpack.i.b16 %v1709_v31, %v1709_v31  ;;  %3681 = vmatprep.subr.bf16.mxu1 %v5135_v52  ;;  %v1717_v35 = vrot.slane %v3476_v50, %v4247_v11  ;;  %v1834_v1 = vcombine.high %v1833_v5, %v1833_v5 }
  0x9a   : > { %v1638_v45 = vcombine.low %v1631_v30, %v1632_v0  ;;  %v1721_v7 = vrot.slane %v1711_v53, %v4247_v11  ;;  %v1645_v60 = vrot.slane %v1637_v57, %v4265_v18  ;;  %v3479_v38 = vpack.i.b16 %v1833_v5, %v1833_v5 }
  0x9b   : > { %v1725_v29 = vrot.slane %v3477_v2, %v4247_v11  ;;  %v1729_v9 = vrot.slane %v1713_v6, %v4247_v11  ;;  %v1731_v15 = vpack.i.b16 %v1717_v35, %v1717_v35  ;;  %v1838_v31 = vunpack.i.h.s16 %v1834_v1 }
  0x9c   : > { %v1652_v24 = vrot.slane %v1638_v45, %v4265_v18  ;;  %v1738_v4 = vpack.i.b16 %v1721_v7, %v1721_v7  ;;  %v1840_v30 = vpack.i.b16 %v1836_v14, %v1836_v14  ;;  %v3480_v0 = vpack.i.b16 %v1834_v1, %v1834_v1 }
  0x9d   : > { %v1745_v13 = vpack.i.b16 %v1725_v29, %v1725_v29  ;;  %v1752_v32 = vpack.i.b16 %v1729_v9, %v1729_v9  ;;  %v4664_v53 = vrot.slane %v1731_v15, %v4247_v11  ;;  %v1842_v6 = vpack.i.b16 %v1838_v31, %v1838_v31 }
  0x9e   : > { %v1653_v50 = vcombine.low %v1645_v60, %v1652_v24  ;;  %v4667_v57 = vrot.slane %v1738_v4, %v4247_v11  ;;  %v1846_v45 = vrot.slane %v3479_v38, %v4247_v11  ;;  %v1850_v14 = vrot.slane %v1840_v30, %v4247_v11  ;;  %3678 = vmatmul.mubr.msk.bf16.vlgmr.msra.gmra.mrb[32].mxu1 %vm362_vm1, %v4355_v48  ;;  %v4686_v60 = vld [vmem:[%s4230_s27 + $0x1a] sm:$0x3] }
  0x9f   : > { %5140 = vst [vmem:[#allocation21_spill] sm:$0xff] %v4664_v53  ;;  %v4670_v5 = vrot.slane %v1745_v13, %v4247_v11  ;;  %v4673_v35 = vrot.slane %v1752_v32, %v4247_v11  ;;  %v1758_v2 = vmul.bf16 %v4607_v37, %v4664_v53  ;;  %v1854_v1 = vrot.slane %v3480_v0, %v4247_v11  ;;  %v4689_v32 = vld [vmem:[%s4230_s27 + $0x1c] sm:$0x3] }
  0xa0   : > { %5141 = vst [vmem:[#allocation22_spill] sm:$0xff] %v4667_v57  ;;  %v1759_v7 = vmul.bf16 %v4607_v37, %v4667_v57  ;;  %v1858_v13 = vrot.slane %v1842_v6, %v4247_v11  ;;  %3682 = vmatpush3.bf16.msra.mxu1 %v1524_v28  ;;  %3683 = vmatprep.mubr.msk.bf16.mxu1 %vm4084_vm0, %v5135_v52 }
  0xa1   : > { %5142 = vst [vmem:[#allocation23_spill] sm:$0xff] %v4670_v5  ;;  %5143 = vst [vmem:[#allocation24_spill] sm:$0xff] %v4673_v35  ;;  %v1760_v29 = vmul.bf16 %v4607_v37, %v4670_v5  ;;  %v1761_v9 = vmul.bf16 %v4607_v37, %v4673_v35  ;;  %v1860_v38 = vpack.i.b16 %v1846_v45, %v1846_v45  ;;  %3687 = vmatprep.subr.bf16.mxu1 %v5135_v52 }
  0xa2   : > { %v1766_v24 = vcombine.low %v1758_v2, %v1759_v7  ;;  %v1867_v15 = vpack.i.b16 %v1850_v14, %v1850_v14  ;;  %v1874_v4 = vpack.i.b16 %v1854_v1, %v1854_v1  ;;  %v1881_v31 = vpack.i.b16 %v1858_v13, %v1858_v13 }
  0xa3   : > { %v1767_v30 = vcombine.low %v1760_v29, %v1761_v9  ;;  %v4699_v0 = vrot.slane %v1860_v38, %v4247_v11  ;;  %v1962_v28 = vrot.slane %v4686_v60, %v4242_v8  ;;  %v2091_v6 = vrot.slane %v4689_v32, %v4242_v8 }
  0xa4   : > { %v1774_v5 = vrot.slane %v1766_v24, %v4265_v18  ;;  %v4707_v37 = vrot.slane %v1867_v15, %v4247_v11  ;;  %v4710_v45 = vrot.slane %v1874_v4, %v4247_v11  ;;  %v4713_v14 = vrot.slane %v1881_v31, %v4247_v11 }
  0xa5   : > { %5144 = vst [vmem:[#allocation25_spill] sm:$0xff] %v4699_v0  ;;  %v1781_v2 = vrot.slane %v1767_v30, %v4265_v18  ;;  %v1887_v7 = vmul.bf16 %v4616_v23, %v4699_v0  ;;  %v1963_v1 = vcombine.high %v1962_v28, %v1962_v28  ;;  %v1965_v13 = vunpack.i.h.s16 %v1962_v28 }
  0xa6   : > { %5145 = vst [vmem:[#allocation26_spill] sm:$0xff] %v4707_v37  ;;  %5146 = vst [vmem:[#allocation27_spill] sm:$0xff] %v4710_v45  ;;  %v1888_v29 = vmul.bf16 %v4616_v23, %v4707_v37  ;;  %v1889_v9 = vmul.bf16 %v4616_v23, %v4710_v45  ;;  %v1890_v38 = vmul.bf16 %v4616_v23, %v4713_v14  ;;  %3684 = vmatmul.mubr.msk.bf16.vlgmr.msra.gmra.mrb[36].mxu1 %vm362_vm1, %v4355_v48 }
  0xa7   : > { %5147 = vst [vmem:[#allocation28_spill] sm:$0xff] %v4713_v14  ;;  %v3482_v24 = vpack.i.b16 %v1962_v28, %v1962_v28  ;;  %v1967_v15 = vunpack.i.h.s16 %v1963_v1  ;;  %v1969_v4 = vpack.i.b16 %v1965_v13, %v1965_v13  ;;  %v3483_v31 = vpack.i.b16 %v1963_v1, %v1963_v1  ;;  %3688 = vmatpush3.bf16.msra.mxu1 %v1653_v50 }
  0xa8   : > { %v1895_v30 = vcombine.low %v1887_v7, %v1888_v29  ;;  %v2092_v35 = vcombine.high %v2091_v6, %v2091_v6  ;;  %3689 = vmatprep.mubr.msk.bf16.mxu1 %vm4084_vm0, %v5135_v52  ;;  %v2094_v28 = vunpack.i.h.s16 %v2091_v6  ;;  %3693 = vmatprep.subr.bf16.mxu1 %v5135_v52  ;;  %v1782_v1 = vcombine.low %v1774_v5, %v1781_v2 }
  0xa9   : > { %v1975_v0 = vrot.slane %v3482_v24, %v4247_v11  ;;  %v1971_v37 = vpack.i.b16 %v1967_v15, %v1967_v15  ;;  %v1979_v45 = vrot.slane %v1969_v4, %v4247_v11  ;;  %v1983_v23 = vrot.slane %v3483_v31, %v4247_v11 }
  0xaa   : > { %v1896_v13 = vcombine.low %v1889_v9, %v1890_v38  ;;  %v2096_v7 = vunpack.i.h.s16 %v2092_v35  ;;  %v3485_v57 = vpack.i.b16 %v2091_v6, %v2091_v6  ;;  %v1903_v53 = vrot.slane %v1895_v30, %v4265_v18  ;;  %v4744_v9 = vld [vmem:[%s4230_s27 + $0x1e] sm:$0x3]  ;;  %s4013_s27 = sshll.u32 %s4086_s4, 4  ;;  %s4014_s27 = int_to_ptr.vmem [resolvable:$false] %s4013_s27 }
  0xab   : > { %v1989_v14 = vpack.i.b16 %v1975_v0, %v1975_v0  ;;  %v1987_v29 = vrot.slane %v1971_v37, %v4247_v11  ;;  %v1996_v24 = vpack.i.b16 %v1979_v45, %v1979_v45  ;;  %v2003_v50 = vpack.i.b16 %v1983_v23, %v1983_v23  ;;  %s4015_s30 = scalar_lea.vmem %s4014_s27, 32  ;;  %p4016_p4 = scmp.lt.s32.totalorder %s5048_s11, %s4014_s27 }
  0xac   : > { %v2098_v4 = vpack.i.b16 %v2094_v28, %v2094_v28  ;;  %v3486_v31 = vpack.i.b16 %v2092_v35, %v2092_v35  ;;  %v2100_v2 = vpack.i.b16 %v2096_v7, %v2096_v7  ;;  %v2104_v37 = vrot.slane %v3485_v57, %v4247_v11  ;;  %p4017_p10 = scmp.lt.s32.totalorder %s4015_s30, %s4009_s26 }
  0xad   : > { %v4735_v15 = vrot.slane %v1989_v14, %v4247_v11  ;;  %v4738_v46 = vrot.slane %v1996_v24, %v4247_v11  ;;  %v4741_v5 = vrot.slane %v2003_v50, %v4247_v11  ;;  %v2010_v0 = vpack.i.b16 %v1987_v29, %v1987_v29 }
  0xae   : > { %v2108_v45 = vrot.slane %v2098_v4, %v4247_v11  ;;  %v2112_v14 = vrot.slane %v3486_v31, %v4247_v11  ;;  %v1910_v35 = vrot.slane %v1896_v13, %v4265_v18  ;;  %v2116_v23 = vrot.slane %v2100_v2, %v4247_v11  ;;  %3690 = vmatmul.mubr.msk.bf16.vlgmr.msra.gmra.mrb[40].mxu1 %vm362_vm1, %v4355_v48  ;;  %p4018_p1 = por %p4017_p10, %p4016_p4 }
  0xaf   : > { %5148 = vst [vmem:[#allocation29_spill] sm:$0xff] %v4741_v5  ;;  %v2016_v6 = vmul.bf16 %v4686_v60, %v4735_v15  ;;  %v4753_v38 = vrot.slane %v2010_v0, %v4247_v11  ;;  %v2017_v30 = vmul.bf16 %v4686_v60, %v4738_v46  ;;  %v2118_v28 = vpack.i.b16 %v2104_v37, %v2104_v37 }
  0xb0   : > { %v2125_v7 = vpack.i.b16 %v2108_v45, %v2108_v45  ;;  %v2132_v57 = vpack.i.b16 %v2112_v14, %v2112_v14  ;;  %v2220_v29 = vrot.slane %v4744_v9, %v4242_v8  ;;  %3694 = vmatpush3.bf16.msra.mxu1 %v1782_v1  ;;  %3695 = vmatprep.mubr.msk.bf16.mxu1 %vm4084_vm0, %v5135_v52  ;;  %p4019_p3 = pnand %p4018_p1, %p4012_p13 }
  0xb1   : > { %5149 = vst [vmem:[#allocation30_spill] sm:$0xff] %v4753_v38  ;;  %v2018_v13 = vmul.bf16 %v4686_v60, %v4741_v5  ;;  %v2019_v24 = vmul.bf16 %v4686_v60, %v4753_v38  ;;  %v2139_v50 = vpack.i.b16 %v2116_v23, %v2116_v23  ;;  %3699 = vmatprep.subr.bf16.mxu1 %v5135_v52 }
  0xb2   : > { %v2024_v4 = vcombine.low %v2016_v6, %v2017_v30  ;;  %v2221_v31 = vcombine.high %v2220_v29, %v2220_v29  ;;  %v4770_v0 = vrot.slane %v2118_v28, %v4247_v11  ;;  %v4773_v8 = vrot.slane %v2125_v7, %v4247_v11 }
  0xb3   : > { %v2223_v1 = vunpack.i.h.s16 %v2220_v29  ;;  %v4776_v2 = vrot.slane %v2132_v57, %v4247_v11  ;;  %v4779_v37 = vrot.slane %v2139_v50, %v4247_v11  ;;  %v1911_v60 = vcombine.low %v1903_v53, %v1910_v35 }
  0xb4   : > { %v2225_v45 = vunpack.i.h.s16 %v2221_v31  ;;  %v2025_v14 = vcombine.low %v2018_v13, %v2019_v24  ;;  %v3488_v23 = vpack.i.b16 %v2220_v29, %v2220_v29  ;;  %v2032_v6 = vrot.slane %v2024_v4, %v4265_v18 }
  0xb5   : > { %v2227_v38 = vpack.i.b16 %v2223_v1, %v2223_v1  ;;  %v3489_v30 = vpack.i.b16 %v2221_v31, %v2221_v31  ;;  %v2145_v7 = vmul.bf16 %v4689_v32, %v4770_v0  ;;  %v2146_v5 = vmul.bf16 %v4689_v32, %v4773_v8 }
  0xb6   : > { %v2229_v28 = vpack.i.b16 %v2225_v45, %v2225_v45  ;;  %v2233_v57 = vrot.slane %v3488_v23, %v4247_v11  ;;  %3696 = vmatmul.mubr.msk.bf16.vlgmr.msra.gmra.mrb[44].mxu1 %vm362_vm1, %v4355_v48  ;;  %v2147_v53 = vmul.bf16 %v4689_v32, %v4776_v2  ;;  %v2148_v35 = vmul.bf16 %v4689_v32, %v4779_v37 }
  0xb7   : > { %v2237_v50 = vrot.slane %v2227_v38, %v4247_v11  ;;  %v2241_v29 = vrot.slane %v3489_v30, %v4247_v11  ;;  %3700 = vmatpush3.bf16.msra.mxu1 %v1911_v60  ;;  %3701 = vmatprep.mubr.msk.bf16.mxu1 %vm4084_vm0, %v5135_v52  ;;  %v2039_v24 = vrot.slane %v2025_v14, %v4265_v18 }
  0xb8   : > { %v2245_v13 = vrot.slane %v2229_v28, %v4247_v11  ;;  %v2247_v38 = vpack.i.b16 %v2233_v57, %v2233_v57  ;;  %3705 = vmatprep.subr.bf16.mxu1 %v5135_v52  ;;  %v2153_v45 = vcombine.low %v2145_v7, %v2146_v5  ;;  %v2154_v23 = vcombine.low %v2147_v53, %v2148_v35 }
  0xb9   : > { %v2254_v4 = vpack.i.b16 %v2237_v50, %v2237_v50  ;;  %v2261_v31 = vpack.i.b16 %v2241_v29, %v2241_v29  ;;  %v2040_v30 = vcombine.low %v2032_v6, %v2039_v24 }
  0xba   : > { %v2268_v1 = vpack.i.b16 %v2245_v13, %v2245_v13  ;;  %v4801_v32 = vrot.slane %v2247_v38, %v4247_v11  ;;  %v2161_v57 = vrot.slane %v2153_v45, %v4265_v18  ;;  %v2168_v5 = vrot.slane %v2154_v23, %v4265_v18 }
  0xbb   : > { %v4804_v28 = vrot.slane %v2254_v4, %v4247_v11  ;;  %v4807_v60 = vrot.slane %v2261_v31, %v4247_v11 }
  0xbc   : > { %v4810_v14 = vrot.slane %v2268_v1, %v4247_v11  ;;  %v2274_v7 = vmul.bf16 %v4744_v9, %v4801_v32  ;;  %v2169_v53 = vcombine.low %v2161_v57, %v2168_v5 }
  0xbd   : > { %v2275_v6 = vmul.bf16 %v4744_v9, %v4804_v28  ;;  %v2276_v11 = vmul.bf16 %v4744_v9, %v4807_v60 }
  0xbe   : > { %3702 = vmatmul.mubr.msk.bf16.vlgmr.msra.gmra.mrb[48].mxu1 %vm362_vm1, %v4355_v48  ;;  %v2277_v50 = vmul.bf16 %v4744_v9, %v4810_v14 }
  0xbf   : > { %3706 = vmatpush3.bf16.msra.mxu1 %v2040_v30  ;;  %3707 = vmatprep.mubr.msk.bf16.mxu1 %vm4084_vm0, %v5135_v52  ;;  %v2282_v35 = vcombine.low %v2274_v7, %v2275_v6 }
  0xc0   : > { %3711 = vmatprep.subr.bf16.mxu1 %v5135_v52  ;;  %v2283_v29 = vcombine.low %v2276_v11, %v2277_v50 }
  0xc1   : > { %v2290_v13 = vrot.slane %v2282_v35, %v4265_v18 }
  0xc2   : > { %v2297_v24 = vrot.slane %v2283_v29, %v4265_v18 }
  0xc4   : > { %v2298_v38 = vcombine.low %v2290_v13, %v2297_v24 }
  0xc6   : > { %3708 = vmatmul.mubr.msk.bf16.vlgmr.msra.gmra.mrb[52].mxu1 %vm362_vm1, %v4355_v48 }
  0xc7   : > { %3712 = vmatpush3.bf16.msra.mxu1 %v2169_v53  ;;  %3713 = vmatprep.mubr.msk.bf16.mxu1 %vm4084_vm0, %v5135_v52 }
  0xc8   : > { %3717 = vmatprep.subr.bf16.mxu1 %v5135_v52 }
  0xce   : > { %3714 = vmatmul.mubr.msk.bf16.vlgmr.msra.gmra.mrb[56].mxu1 %vm362_vm1, %v4355_v48 }
  0xcf   : > { %3718 = vmatpush3.bf16.msra.mxu1 %v2298_v38  ;;  %3719 = vmatprep.mubr.msk.bf16.mxu1 %vm4084_vm0, %v5135_v52 }
  0xd6   : > { %3720 = vmatmul.mubr.msk.bf16.vlgmr.msra.gmra.mrb[60].mxu1 %vm362_vm1, %v4355_v48 }
  0xd7   : > { %3855 = vmatprep.mubr.msk.f32.mxu1 %vm4084_vm0, %v5135_v52 }
 0x131   : > { %v400_v9 = vpop.f32.mrb[0].mxu1 }
 0x132   : > { %v3631_v4 = vpop.f32.mrb[1].mxu1  ;;  %v406_v11 = vpack.c.bf16 %v400_v9, %v400_v9 }
 0x133   : > { %v403_v31 = vpop.f32.mrb[2].mxu1 }
 0x134   : > { %v3632_v18 = vpop.f32.mrb[3].mxu1  ;;  %v2344_v38 = vmul.bf16 %v406_v11, %v4285_v47  ;;  %v2345_v4 = vmul.bf16 %v406_v11, %v4292_v54  ;;  %v2347_v31 = vmul.bf16 %v406_v11, %v4308_v62 }
 0x139   : > { %v528_v1 = vpop.f32.mrb[4].mxu1 }
 0x13a   : > { %v534_v45 = vadd.f32 %v528_v1, %v400_v9  ;;  %v535_v23 = vpack.c.bf16 %v528_v1, %v528_v1  ;;  %v3637_v30 = vpop.f32.mrb[5].mxu1  ;;  %v2346_v9 = vmul.bf16 %v406_v11, %v4295_v55 }
 0x13b   : > { %v531_v57 = vpop.f32.mrb[6].mxu1 }
 0x13c   : > { %v3638_v5 = vpop.f32.mrb[7].mxu1  ;;  %v2348_v7 = vmul.bf16 %v535_v23, %v4289_v51  ;;  %v2349_v6 = vmul.bf16 %v535_v23, %v4300_v58  ;;  %v2350_v48 = vmul.bf16 %v535_v23, %v4303_v59  ;;  %v2351_v53 = vmul.bf16 %v535_v23, %v4315_v3  ;;  %v4852_v58 = vld [vmem:[%s5092_s2] sm:$0xf] }
 0x13d   : > { %v3494_v3 = vcombine.low %v2344_v38, %v2345_v4  ;;  %v3495_v1 = vcombine.low %v2346_v9, %v2347_v31 }
 0x13e   : > { %v3491_v50 = vcombine.low %v2348_v7, %v2349_v6  ;;  %v3492_v13 = vcombine.low %v2350_v48, %v2351_v53 }
 0x140   : > { %3724 = vmatpush3.bf16.msra.mxu0 %v3491_v50 }
 0x141   : > { %v657_v35 = vpop.f32.mrb[8].mxu1  ;;  %3725 = vmatprep.subr.bf16.mxu0 %v5135_v52 }
 0x142   : > { %v663_v29 = vadd.f32 %v657_v35, %v534_v45  ;;  %v3643_v24 = vpop.f32.mrb[9].mxu1  ;;  %v664_v47 = vpack.c.bf16 %v657_v35, %v657_v35 }
 0x143   : > { %v660_v51 = vpop.f32.mrb[10].mxu1 }
 0x144   : > { %3726 = vmatpush3.bf16.msra.mxu0 %v3492_v13  ;;  %v3644_v59 = vpop.f32.mrb[11].mxu1  ;;  %v2460_v55 = vmul.bf16 %v664_v47, %v4336_v36  ;;  %v2461_v62 = vmul.bf16 %v664_v47, %v4340_v40  ;;  %v2462_v5 = vmul.bf16 %v664_v47, %v4343_v41  ;;  %v2463_v7 = vmul.bf16 %v664_v47, %v4346_v44 }
 0x145   : > { %3731 = vmatprep.subr.bf16.mxu0 %v5135_v52 }
 0x146   : > { %v3497_v57 = vcombine.low %v2460_v55, %v2461_v62  ;;  %v3498_v36 = vcombine.low %v2462_v5, %v2463_v7 }
 0x147   : > { %3728 = vmatmul.mubr.msk.bf16.vlgmr.msra.gmra.mrb[0].mxu0 %vm2364_vm2, %v4852_v58 }
 0x148   : > { %3732 = vmatpush3.bf16.msra.mxu0 %v3494_v3  ;;  %3735 = vmatprep.mubr.msk.bf16.mxu0 %vm4084_vm0, %v5135_v52 }
 0x149   : > { %v786_v54 = vpop.f32.mrb[12].mxu1  ;;  %3733 = vmatprep.subr.bf16.mxu0 %v5135_v52 }
 0x14a   : > { %v792_v18 = vadd.f32 %v786_v54, %v663_v29  ;;  %v3649_v45 = vpop.f32.mrb[13].mxu1  ;;  %v793_v53 = vpack.c.bf16 %v786_v54, %v786_v54 }
 0x14b   : > { %v789_v23 = vpop.f32.mrb[14].mxu1 }
 0x14c   : > { %3734 = vmatpush3.bf16.msra.mxu0 %v3495_v1  ;;  %v3650_v30 = vpop.f32.mrb[15].mxu1  ;;  %v2517_v40 = vmul.bf16 %v793_v53, %v4379_v22  ;;  %v2518_v41 = vmul.bf16 %v793_v53, %v4384_v25  ;;  %v2519_v51 = vmul.bf16 %v793_v53, %v4387_v26  ;;  %v2520_v59 = vmul.bf16 %v793_v53, %v4393_v10 }
 0x14d   : > { %3739 = vmatprep.subr.bf16.mxu0 %v5135_v52 }
 0x14e   : > { %v3500_v4 = vcombine.low %v2517_v40, %v2518_v41  ;;  %v3501_v22 = vcombine.low %v2519_v51, %v2520_v59 }
 0x151   : > { %v915_v6 = vpop.f32.mrb[16].mxu1 }
 0x152   : > { %v921_v11 = vadd.f32 %v915_v6, %v792_v18  ;;  %v3655_v50 = vpop.f32.mrb[17].mxu1  ;;  %v922_v3 = vpack.c.bf16 %v915_v6, %v915_v6 }
 0x153   : > { %3736 = vmatmul.mubr.msk.bf16.vlgmr.msra.gmra.mrb[0].mxu0 %vm2364_vm2, %v4852_v58  ;;  %v918_v48 = vpop.f32.mrb[18].mxu1 }
 0x154   : > { %3740 = vmatpush3.bf16.msra.mxu0 %v3497_v57  ;;  %v3656_v35 = vpop.f32.mrb[19].mxu1  ;;  %3743 = vmatprep.mubr.msk.bf16.mxu0 %vm4084_vm0, %v5135_v52  ;;  %v2574_v26 = vmul.bf16 %v922_v3, %v4420_v56  ;;  %v2575_v10 = vmul.bf16 %v922_v3, %v4423_v20  ;;  %v2576_v1 = vmul.bf16 %v922_v3, %v4428_v61 }
 0x155   : > { %3741 = vmatprep.subr.bf16.mxu0 %v5135_v52  ;;  %v2577_v45 = vmul.bf16 %v922_v3, %v4431_v63 }
 0x156   : > { %v3503_v18 = vcombine.low %v2574_v26, %v2575_v10 }
 0x157   : > { %v3504_v56 = vcombine.low %v2576_v1, %v2577_v45 }
 0x158   : > { %3742 = vmatpush3.bf16.msra.mxu0 %v3498_v36 }
 0x159   : > { %v1044_v44 = vpop.f32.mrb[20].mxu1  ;;  %3747 = vmatprep.subr.bf16.mxu0 %v5135_v52 }
 0x15a   : > { %v1050_v29 = vadd.f32 %v1044_v44, %v921_v11  ;;  %v3661_v13 = vpop.f32.mrb[21].mxu1  ;;  %v1051_v57 = vpack.c.bf16 %v1044_v44, %v1044_v44 }
 0x15b   : > { %v1047_v24 = vpop.f32.mrb[22].mxu1 }
 0x15c   : > { %v3662_v38 = vpop.f32.mrb[23].mxu1  ;;  %v2631_v20 = vmul.bf16 %v1051_v57, %v4452_v39  ;;  %v2632_v61 = vmul.bf16 %v1051_v57, %v4455_v42  ;;  %v2633_v53 = vmul.bf16 %v1051_v57, %v4459_v49  ;;  %v2634_v35 = vmul.bf16 %v1051_v57, %v4465_v16 }
 0x15e   : > { %v3506_v48 = vcombine.low %v2631_v20, %v2632_v61  ;;  %v3507_v39 = vcombine.low %v2633_v53, %v2634_v35  ;;  %v5153_v61 = vld [vmem:[#allocation12_spill] sm:$0xff] }
 0x15f   : > { %3744 = vmatmul.mubr.msk.bf16.vlgmr.msra.gmra.mrb[0].mxu0 %vm2364_vm2, %v4852_v58 }
 0x160   : > { %3748 = vmatpush3.bf16.msra.mxu0 %v3500_v4  ;;  %3751 = vmatprep.mubr.msk.bf16.mxu0 %vm4084_vm0, %v5135_v52 }
 0x161   : > { %v1173_v25 = vpop.f32.mrb[24].mxu1  ;;  %3749 = vmatprep.subr.bf16.mxu0 %v5135_v52 }
 0x162   : > { %v1179_v9 = vadd.f32 %v1173_v25, %v1050_v29  ;;  %v3667_v31 = vpop.f32.mrb[25].mxu1  ;;  %v1180_v36 = vpack.c.bf16 %v1173_v25, %v1173_v25 }
 0x163   : > { %v1176_v47 = vpop.f32.mrb[26].mxu1 }
 0x164   : > { %3750 = vmatpush3.bf16.msra.mxu0 %v3501_v22  ;;  %v3668_v54 = vpop.f32.mrb[27].mxu1  ;;  %v2688_v49 = vmul.bf16 %v1180_v36, %v4490_v19  ;;  %v2689_v16 = vmul.bf16 %v1180_v36, %v4493_v21  ;;  %v2690_v24 = vmul.bf16 %v1180_v36, %v4496_v12  ;;  %v2691_v38 = vmul.bf16 %v1180_v36, %v4502_v17  ;;  %v5154_v36 = vld [vmem:[#allocation13_spill] sm:$0xff] }
 0x165   : > { %3755 = vmatprep.subr.bf16.mxu0 %v5135_v52 }
 0x166   : > { %v3509_v13 = vcombine.low %v2688_v49, %v2689_v16  ;;  %v3510_v21 = vcombine.low %v2690_v24, %v2691_v38  ;;  %v5156_v24 = vld [vmem:[#allocation15_spill] sm:$0xff] }
 0x169   : > { %v1302_v23 = vpop.f32.mrb[28].mxu1 }
 0x16a   : > { %v1308_v30 = vadd.f32 %v1302_v23, %v1179_v9  ;;  %v3673_v55 = vpop.f32.mrb[29].mxu1  ;;  %v1309_v22 = vpack.c.bf16 %v1302_v23, %v1302_v23 }
 0x16b   : > { %3752 = vmatmul.mubr.msk.bf16.vlgmr.msra.gmra.mrb[0].mxu0 %vm2364_vm2, %v4852_v58  ;;  %v1305_v62 = vpop.f32.mrb[30].mxu1 }
 0x16c   : > { %3756 = vmatpush3.bf16.msra.mxu0 %v3503_v18  ;;  %v3674_v5 = vpop.f32.mrb[31].mxu1  ;;  %3759 = vmatprep.mubr.msk.bf16.mxu0 %vm4084_vm0, %v5135_v52  ;;  %v2745_v12 = vmul.bf16 %v1309_v22, %v4522_v33  ;;  %v2746_v17 = vmul.bf16 %v1309_v22, %v4525_v34  ;;  %v2747_v10 = vmul.bf16 %v1309_v22, %v4530_v43  ;;  %v5151_v62 = vld [vmem:[#allocation10_spill] sm:$0xff] }
 0x16d   : > { %3757 = vmatprep.subr.bf16.mxu0 %v5135_v52  ;;  %v2748_v18 = vmul.bf16 %v1309_v22, %v4533_v27  ;;  %v5150_v27 = vld [vmem:[#allocation9_spill] sm:$0xff] }
 0x16e   : > { %v3512_v26 = vcombine.low %v2745_v12, %v2746_v17 }
 0x16f   : > { %v3513_v34 = vcombine.low %v2747_v10, %v2748_v18  ;;  %v5160_v10 = vld [vmem:[#allocation19_spill] sm:$0xff] }
 0x170   : > { %3758 = vmatpush3.bf16.msra.mxu0 %v3504_v56  ;;  %v5152_v56 = vld [vmem:[#allocation11_spill] sm:$0xff] }
 0x171   : > { %v1431_v63 = vpop.f32.mrb[32].mxu1  ;;  %3763 = vmatprep.subr.bf16.mxu0 %v5135_v52 }
 0x172   : > { %v1437_v7 = vadd.f32 %v1431_v63, %v1308_v30  ;;  %v3679_v6 = vpop.f32.mrb[33].mxu1  ;;  %v1438_v33 = vpack.c.bf16 %v1431_v63, %v1431_v63 }
 0x173   : > { %v1434_v11 = vpop.f32.mrb[34].mxu1 }
 0x174   : > { %v3680_v50 = vpop.f32.mrb[35].mxu1  ;;  %v2802_v55 = vmul.bf16 %v1438_v33, %v5150_v27  ;;  %v2803_v57 = vmul.bf16 %v1438_v33, %v5151_v62  ;;  %v2804_v20 = vmul.bf16 %v1438_v33, %v5152_v56  ;;  %v2805_v63 = vmul.bf16 %v1438_v33, %v5153_v61  ;;  %v5161_v33 = vld [vmem:[#allocation20_spill] sm:$0xff]  ;;  %v5163_v27 = vld [vmem:[#allocation22_spill] sm:$0xff] }
 0x175   : > { %v5165_v56 = vld [vmem:[#allocation24_spill] sm:$0xff] }
 0x176   : > { %v3515_v5 = vcombine.low %v2802_v55, %v2803_v57  ;;  %v3516_v35 = vcombine.low %v2804_v20, %v2805_v63  ;;  %v5164_v57 = vld [vmem:[#allocation23_spill] sm:$0xff]  ;;  %v5166_v63 = vld [vmem:[#allocation25_spill] sm:$0xff] }
 0x177   : > { %3760 = vmatmul.mubr.msk.bf16.vlgmr.msra.gmra.mrb[0].mxu0 %vm2364_vm2, %v4852_v58 }
 0x178   : > { %3764 = vmatpush3.bf16.msra.mxu0 %v3506_v48  ;;  %3767 = vmatprep.mubr.msk.bf16.mxu0 %vm4084_vm0, %v5135_v52 }
 0x179   : > { %v1560_v42 = vpop.f32.mrb[36].mxu1  ;;  %3765 = vmatprep.subr.bf16.mxu0 %v5135_v52 }
 0x17a   : > { %v1566_v40 = vadd.f32 %v1560_v42, %v1437_v7  ;;  %v3685_v41 = vpop.f32.mrb[37].mxu1  ;;  %v1567_v48 = vpack.c.bf16 %v1560_v42, %v1560_v42 }
 0x17b   : > { %v1563_v44 = vpop.f32.mrb[38].mxu1 }
 0x17c   : > { %3766 = vmatpush3.bf16.msra.mxu0 %v3507_v39  ;;  %v3686_v29 = vpop.f32.mrb[39].mxu1  ;;  %v2859_v39 = vmul.bf16 %v1567_v48, %v5154_v36  ;;  %v2861_v38 = vmul.bf16 %v1567_v48, %v5156_v24  ;;  %v5169_v36 = vld [vmem:[#allocation28_spill] sm:$0xff] }
 0x17d   : > { %3771 = vmatprep.subr.bf16.mxu0 %v5135_v52 }
 0x181   : > { %v4907_v4 = vpop.f32.mrb[40].mxu1 }
 0x182   : > { %v1695_v51 = vadd.f32 %v4907_v4, %v1566_v40  ;;  %v3691_v59 = vpop.f32.mrb[41].mxu1  ;;  %v5155_v40 = vld [vmem:[#allocation14_spill] sm:$0xff] }
 0x183   : > { %3768 = vmatmul.mubr.msk.bf16.vlgmr.msra.gmra.mrb[0].mxu0 %vm2364_vm2, %v4852_v58  ;;  %v1692_v3 = vpop.f32.mrb[42].mxu1  ;;  %v2860_v41 = vmul.bf16 %v1567_v48, %v5155_v40 }
 0x184   : > { %3772 = vmatpush3.bf16.msra.mxu0 %v3509_v13  ;;  %v3692_v19 = vpop.f32.mrb[43].mxu1  ;;  %3775 = vmatprep.mubr.msk.bf16.mxu0 %vm4084_vm0, %v5135_v52  ;;  %v1696_v3 = vpack.c.bf16 %v4907_v4, %v4907_v4 }
 0x185   : > { %3773 = vmatprep.subr.bf16.mxu0 %v5135_v52  ;;  %v3518_v13 = vcombine.low %v2859_v39, %v2860_v41 }
 0x186   : > { %v2918_v18 = vmul.bf16 %v1696_v3, %v5160_v10 }
 0x188   : > { %3774 = vmatpush3.bf16.msra.mxu0 %v3510_v21 }
 0x189   : > { %v4917_v25 = vpop.f32.mrb[44].mxu1  ;;  %3779 = vmatprep.subr.bf16.mxu0 %v5135_v52 }
 0x18a   : > { %v1824_v9 = vadd.f32 %v4917_v25, %v1695_v51  ;;  %v3697_v31 = vpop.f32.mrb[45].mxu1  ;;  %v5157_v51 = vld [vmem:[#allocation16_spill] sm:$0xff] }
 0x18b   : > { %v1821_v47 = vpop.f32.mrb[46].mxu1  ;;  %v2862_v59 = vmul.bf16 %v1567_v48, %v5157_v51 }
 0x18c   : > { %v3698_v54 = vpop.f32.mrb[47].mxu1  ;;  %v5159_v47 = vld [vmem:[#allocation18_spill] sm:$0xff] }
 0x18d   : > { %v3519_v22 = vcombine.low %v2861_v38, %v2862_v59  ;;  %v2917_v54 = vmul.bf16 %v1696_v3, %v5159_v47 }
 0x18f   : > { %3776 = vmatmul.mubr.msk.bf16.vlgmr.msra.gmra.mrb[0].mxu0 %vm2364_vm2, %v4852_v58 }
 0x190   : > { %3780 = vmatpush3.bf16.msra.mxu0 %v3512_v26  ;;  %3783 = vmatprep.mubr.msk.bf16.mxu0 %vm4084_vm0, %v5135_v52 }
 0x191   : > { %v4927_v1 = vpop.f32.mrb[48].mxu1  ;;  %3781 = vmatprep.subr.bf16.mxu0 %v5135_v52 }
 0x192   : > { %v1953_v45 = vadd.f32 %v4927_v1, %v1824_v9  ;;  %v3703_v23 = vpop.f32.mrb[49].mxu1  ;;  %v5158_v9 = vld [vmem:[#allocation17_spill] sm:$0xff] }
 0x193   : > { %v1950_v30 = vpop.f32.mrb[50].mxu1  ;;  %v2916_v31 = vmul.bf16 %v1696_v3, %v5158_v9 }
 0x194   : > { %3782 = vmatpush3.bf16.msra.mxu0 %v3513_v34  ;;  %v3704_v43 = vpop.f32.mrb[51].mxu1  ;;  %v2919_v34 = vmul.bf16 %v1696_v3, %v5161_v33  ;;  %v5162_v30 = vld [vmem:[#allocation21_spill] sm:$0xff] }
 0x195   : > { %3787 = vmatprep.subr.bf16.mxu0 %v5135_v52  ;;  %v3521_v26 = vcombine.low %v2916_v31, %v2917_v54 }
 0x196   : > { %v3522_v23 = vcombine.low %v2918_v18, %v2919_v34 }
 0x199   : > { %v4936_v7 = vpop.f32.mrb[52].mxu1 }
 0x19a   : > { %v2082_v6 = vadd.f32 %v4936_v7, %v1953_v45  ;;  %v3709_v11 = vpop.f32.mrb[53].mxu1  ;;  %v1825_v45 = vpack.c.bf16 %v4917_v25, %v4917_v25  ;;  %v1954_v25 = vpack.c.bf16 %v4927_v1, %v4927_v1  ;;  %v2083_v1 = vpack.c.bf16 %v4936_v7, %v4936_v7 }
 0x19b   : > { %3784 = vmatmul.mubr.msk.bf16.vlgmr.msra.gmra.mrb[0].mxu0 %vm2364_vm2, %v4852_v58  ;;  %v2079_v50 = vpop.f32.mrb[54].mxu1  ;;  %v5167_v11 = vld [vmem:[#allocation26_spill] sm:$0xff] }
 0x19c   : > { %3788 = vmatpush3.bf16.msra.mxu0 %v3515_v5  ;;  %v3710_v53 = vpop.f32.mrb[55].mxu1  ;;  %3791 = vmatprep.mubr.msk.bf16.mxu0 %vm4084_vm0, %v5135_v52  ;;  %v2973_v43 = vmul.bf16 %v1825_v45, %v5162_v30  ;;  %v2974_v55 = vmul.bf16 %v1825_v45, %v5163_v27  ;;  %v2975_v5 = vmul.bf16 %v1825_v45, %v5164_v57 }
 0x19d   : > { %3789 = vmatprep.subr.bf16.mxu0 %v5135_v52  ;;  %v2976_v20 = vmul.bf16 %v1825_v45, %v5165_v56  ;;  %v3031_v50 = vmul.bf16 %v1954_v25, %v5167_v11  ;;  %v5168_v53 = vld [vmem:[#allocation27_spill] sm:$0xff]  ;;  %v3033_v39 = vmul.bf16 %v1954_v25, %v5169_v36  ;;  %v3087_v41 = vmul.bf16 %v2083_v1, %v4735_v15 }
 0x19e   : > { %v3524_v62 = vcombine.low %v2973_v43, %v2974_v55 }
 0x19f   : > { %v3525_v61 = vcombine.low %v2975_v5, %v2976_v20 }
 0x1a0   : > { %3790 = vmatpush3.bf16.msra.mxu0 %v3516_v35  ;;  %v3032_v35 = vmul.bf16 %v1954_v25, %v5168_v53 }
 0x1a1   : > { %v4946_v44 = vpop.f32.mrb[56].mxu1  ;;  %3795 = vmatprep.subr.bf16.mxu0 %v5135_v52 }
 0x1a2   : > { %v2211_v29 = vadd.f32 %v4946_v44, %v2082_v6  ;;  %v3715_v42 = vpop.f32.mrb[57].mxu1  ;;  %v3030_v6 = vmul.bf16 %v1954_v25, %v5166_v63  ;;  %v3528_v40 = vcombine.low %v3032_v35, %v3033_v39  ;;  %v2212_v7 = vpack.c.bf16 %v4946_v44, %v4946_v44 }
 0x1a3   : > { %v2208_v49 = vpop.f32.mrb[58].mxu1 }
 0x1a4   : > { %v3716_v16 = vpop.f32.mrb[59].mxu1  ;;  %v3527_v48 = vcombine.low %v3030_v6, %v3031_v50  ;;  %v5170_v49 = vld [vmem:[#allocation29_spill] sm:$0xff]  ;;  %v3145_v15 = vmul.bf16 %v2212_v7, %v4773_v8  ;;  %v3146_v59 = vmul.bf16 %v2212_v7, %v4776_v2  ;;  %v3147_v3 = vmul.bf16 %v2212_v7, %v4779_v37 }
 0x1a5   : > { %v3089_v16 = vmul.bf16 %v2083_v1, %v5170_v49 }
 0x1a7   : > { %3792 = vmatmul.mubr.msk.bf16.vlgmr.msra.gmra.mrb[0].mxu0 %vm2364_vm2, %v4852_v58 }
 0x1a8   : > { %3796 = vmatpush3.bf16.msra.mxu0 %v3518_v13  ;;  %3799 = vmatprep.mubr.msk.bf16.mxu0 %vm4084_vm0, %v5135_v52  ;;  %v5171_v13 = vld [vmem:[#allocation30_spill] sm:$0xff] }
 0x1a9   : > { %v4958_v19 = vpop.f32.mrb[60].mxu1  ;;  %3797 = vmatprep.subr.bf16.mxu0 %v5135_v52  ;;  %v3090_v24 = vmul.bf16 %v2083_v1, %v5171_v13 }
 0x1aa   : > { %v4962_v21 = vadd.f32 %v4958_v19, %v2211_v29  ;;  %v3721_v12 = vpop.f32.mrb[61].mxu1  ;;  %v3088_v29 = vmul.bf16 %v2083_v1, %v4738_v46  ;;  %v3144_v46 = vmul.bf16 %v2212_v7, %v4770_v0  ;;  %v2341_v44 = vpack.c.bf16 %v4958_v19, %v4958_v19 }
 0x1ab   : > { %v2337_v17 = vpop.f32.mrb[62].mxu1  ;;  %v3531_v38 = vcombine.low %v3089_v16, %v3090_v24 }
 0x1ac   : > { %3798 = vmatpush3.bf16.msra.mxu0 %v3519_v22  ;;  %v3722_v4 = vpop.f32.mrb[63].mxu1  ;;  %v3530_v42 = vcombine.low %v3087_v41, %v3088_v29  ;;  %v3533_v51 = vcombine.low %v3144_v46, %v3145_v15  ;;  %v3534_v22 = vcombine.low %v3146_v59, %v3147_v3  ;;  %v3201_v0 = vmul.bf16 %v2341_v44, %v4801_v32 }
 0x1ad   : > { %3803 = vmatprep.subr.bf16.mxu0 %v5135_v52  ;;  %v3202_v8 = vmul.bf16 %v2341_v44, %v4804_v28  ;;  %v3203_v37 = vmul.bf16 %v2341_v44, %v4807_v60  ;;  %v3204_v12 = vmul.bf16 %v2341_v44, %v4810_v14  ;;  %v4085_v32 = vmov 0.0|0.0  }
 0x1ae   : > { %3858 = vmatprep.subr.bf16.mxu1 %v4085_v32  ;;  %v2342_v60 = vmax.f32 %v4962_v21, 0.0 }
 0x1af   : > { %v3536_v2 = vcombine.low %v3201_v0, %v3202_v8  ;;  %v3537_v19 = vcombine.low %v3203_v37, %v3204_v12 }
 0x1b3   : > { %3800 = vmatmul.mubr.msk.bf16.vlgmr.msra.gmra.mrb[0].mxu0 %vm2364_vm2, %v4852_v58 }
 0x1b4   : > { %3804 = vmatpush3.bf16.msra.mxu0 %v3521_v26  ;;  %3807 = vmatprep.mubr.msk.bf16.mxu0 %vm4084_vm0, %v5135_v52 }
 0x1b5   : > { %3805 = vmatprep.subr.bf16.mxu0 %v5135_v52 }
 0x1b8   : > { %3806 = vmatpush3.bf16.msra.mxu0 %v3522_v23 }
 0x1b9   : > { %3811 = vmatprep.subr.bf16.mxu0 %v5135_v52 }
 0x1bf   : > { %3808 = vmatmul.mubr.msk.bf16.vlgmr.msra.gmra.mrb[0].mxu0 %vm2364_vm2, %v4852_v58 }
 0x1c0   : > { %3812 = vmatpush3.bf16.msra.mxu0 %v3524_v62  ;;  %3815 = vmatprep.mubr.msk.bf16.mxu0 %vm4084_vm0, %v5135_v52 }
 0x1c1   : > { %3813 = vmatprep.subr.bf16.mxu0 %v5135_v52 }
 0x1c4   : > { %3814 = vmatpush3.bf16.msra.mxu0 %v3525_v61 }
 0x1c5   : > { %3819 = vmatprep.subr.bf16.mxu0 %v5135_v52 }
 0x1cb   : > { %3816 = vmatmul.mubr.msk.bf16.vlgmr.msra.gmra.mrb[0].mxu0 %vm2364_vm2, %v4852_v58 }
 0x1cc   : > { %3820 = vmatpush3.bf16.msra.mxu0 %v3527_v48  ;;  %3823 = vmatprep.mubr.msk.bf16.mxu0 %vm4084_vm0, %v5135_v52 }
 0x1cd   : > { %3821 = vmatprep.subr.bf16.mxu0 %v5135_v52 }
 0x1d0   : > { %3822 = vmatpush3.bf16.msra.mxu0 %v3528_v40 }
 0x1d1   : > { %3827 = vmatprep.subr.bf16.mxu0 %v5135_v52 }
 0x1d7   : > { %3824 = vmatmul.mubr.msk.bf16.vlgmr.msra.gmra.mrb[0].mxu0 %vm2364_vm2, %v4852_v58 }
 0x1d8   : > { %3828 = vmatpush3.bf16.msra.mxu0 %v3530_v42  ;;  %3831 = vmatprep.mubr.msk.bf16.mxu0 %vm4084_vm0, %v5135_v52 }
 0x1d9   : > { %3829 = vmatprep.subr.bf16.mxu0 %v5135_v52 }
 0x1dc   : > { %3830 = vmatpush3.bf16.msra.mxu0 %v3531_v38 }
 0x1dd   : > { %3835 = vmatprep.subr.bf16.mxu0 %v5135_v52 }
 0x1e3   : > { %3832 = vmatmul.mubr.msk.bf16.vlgmr.msra.gmra.mrb[0].mxu0 %vm2364_vm2, %v4852_v58 }
 0x1e4   : > { %3836 = vmatpush3.bf16.msra.mxu0 %v3533_v51  ;;  %3839 = vmatprep.mubr.msk.bf16.mxu0 %vm4084_vm0, %v5135_v52 }
 0x1e5   : > { %3837 = vmatprep.subr.bf16.mxu0 %v5135_v52 }
 0x1e8   : > { %3838 = vmatpush3.bf16.msra.mxu0 %v3534_v22 }
 0x1e9   : > { %3843 = vmatprep.subr.bf16.mxu0 %v5135_v52 }
 0x1ef   : > { %3840 = vmatmul.mubr.msk.bf16.vlgmr.msra.gmra.mrb[0].mxu0 %vm2364_vm2, %v4852_v58 }
 0x1f0   : > { %3844 = vmatpush3.bf16.msra.mxu0 %v3536_v2  ;;  %3847 = vmatprep.mubr.msk.bf16.mxu0 %vm4084_vm0, %v5135_v52 }
 0x1f1   : > { %3845 = vmatprep.subr.bf16.mxu0 %v5135_v52  ;;  %v3259_v52 = vld [vmem:[%s5093_s3] sm:$0x1] }
 0x1f4   : > { %3846 = vmatpush3.bf16.msra.mxu0 %v3537_v19 }
 0x1fb   : > { %3848 = vmatmul.mubr.msk.bf16.vlgmr.msra.gmra.mrb[0].mxu0 %vm2364_vm2, %v4852_v58  ;;  %v3261_v58 = vstv %s3260_s8 }
 0x2ce   : > { %v3251_v28 = vpop.f32.mrb[0].mxu0 }
 0x2cf   : > { %v3258_v14 = vmax.f32 %v3251_v28, 0.0  ;;  %v3849_v17 = vpop.f32.mrb[1].mxu0 }
 0x2d0   : > { %v3254_v9 = vpop.f32.mrb[2].mxu0 }
 0x2d1   : > { %v3859_v31 = vpack.c.bf16 %v3258_v14, %v2342_v60  ;;  %v3850_v47 = vpop.f32.mrb[3].mxu0 }
 0x2d3   : > { %3860 = vmatpush3.bf16.msra.mxu1 %v3859_v31 }
 0x2d6   : > { %3856 = vmatmul.mubr.msk.f32.vlgmr.msra.gmra.mrb[64].mxu1 %vm362_vm1, %v3259_v52 }
 0x3a9   : > { %v3331_v54 = vpop.f32.mrb[64].mxu1 }
 0x3aa   : > { %v3332_v4 = vadd.f32 %v3331_v54, %v3261_v58  ;;  %v3857_v21 = vpop.f32.mrb[65].mxu1 }
 0x3ac   : > { %v3540_v26 = vmul.f32 -1.442695, %v3332_v4 }
 0x3ae   : > { %3975 = vpow2.f32 %v3540_v26 }
 0x3b8   : > { %v3976_v10 = vpop.eup %3975 }
 0x3b9   : > { %v3338_v18 = vadd.f32 1.0, %v3976_v10 }
 0x3bb   : > { %3977 = vrcp.f32 %v3338_v18 }
 0x3c5   : > { %v3978_v33 = vpop.eup %3977 }
 0x3c6   : > { %3341 = vst [vmem:[%s241_s10] sm:$0x1] %v3978_v33 }
 0x3c7   : > { %4022 = shalt.err (!%p4019_p3)
}
 0x3c8   : > { %s4023_s19 = scalar_lea.hbm %s5046_s18, 16  ;;  %s4027_s16 = scalar_lea.hbm %s5095_s5, 32 }
 0x3c9   : > { %p4024_p5 = scmp.ne.s32.totalorder %s5046_s18, %s4023_s19  ;;  %p4028_p9 = scmp.lt.u32.totalorder %s5046_s18, %s5095_s5 }
 0x3ca   : > { %p4029_p0 = scmp.lt.u32.totalorder %s4027_s16, %s4023_s19  ;;  %p4031_p6 = scmp.lt.u32.totalorder %s4023_s19, %s5046_s18 }
 0x3cb   : > { %p4025_p7 = pnand %p4024_p5, %p5172_p11 }
 0x3cc   : > { %p4030_p2 = por %p4029_p0, %p4028_p9 }
 0x3cd   : > { %p4026_p8 = pneg %p4025_p7 }
 0x3ce   : > { %p4032_p12 = por %p4031_p6, %p4030_p2 }
 0x3d0   : > { %p4033_p13 = pnand %p4032_p12, %p4026_p8 }
 0x3d2   : > { %4036 = shalt.err (!%p4033_p13)
}
 0x3d3   : > { %3923 = dma.vmem_to_hbm [thread:$0]  (%p5172_p11), %s5048_s11, 16, %s5046_s18, %s3343_s24  }
 0x3d4 PF: > { %s3367_s8 = sand.u32 1, %s4063_s20   ;;  %p5173_p4 = scmp.ne.s32.totalorder %s5124_s7, 0 }
 0x3d5   : > { %p5174_p10 = scmp.ge.s32.totalorder %s4075_s23, 2  ;;  %s3368_s9 = scalar_lea.sflag [#allocation5], %s3367_s8 }
 0x3d7   : > { %p3930_p1 = pnand %p5174_p10, %p5173_p4 }
 0x3d9   : > { %4058 = dma.done.wait (!%p3930_p1), %s3368_s9, 16  }
 0x3da   : > { %4060 = vsyncadd (!%p3930_p1), %s3368_s9, 4294967280  ;;  %p19_p3 = scmp.ge.s32.totalorder %s4145_s25, 4   ;;  %s5175_s20 = smov %s4067_s21 }
 0x3db   : > { %s5176_s21 = smov %s4071_s22  ;;  %s5177_s22 = smov %s4157_s28 }
 0x3dc   : > { %s5178_s23 = smov %s4145_s25  ;;  %21 = sbr.rel (!%p19_p3) target bundleno = 7 (0x7), region = 100 }
 0x3e3   :  { %3372 = vsyncpa [#allocation4], 1 }
 0x3e4   :  { %3374 = vsyncpa [#allocation4 + $0x1], 1 }
 0x3e5   :  { %3375 = vsyncpa [#allocation5], 1 }
 0x3e6   :  { %3377 = vsyncpa [#allocation5 + $0x1], 1 }

</bundles_post_ra>
